<compile_context>
chip_gen: v5e
topology: v5e:2x2
jax: 0.10.0
libtpu: 0.0.40
codegen_flags: <defaults>
</compile_context>

<pallas_src>
import functools
import math

import jax
import jax.numpy as jnp
import numpy as np
from jax import lax
from jax.experimental import pallas as pl
from jax.experimental.pallas import tpu as pltpu


# ----------------------------------------------------------------------------
# In-kernel multi-head attention helper (shared by the cross / self kernels).
# ----------------------------------------------------------------------------
def _mha_into_scratch(Q, K, V, attn_ref, *, num_heads, group, tgt_len, src_len,
                      use_mask, compute_dtype, approx):
    """Q: (group*tgt_len, D); K/V: (group*src_len, D), already in compute dtype.

    Per-head softmax(Q Kᵀ) V, written head-by-head into the f32 VMEM scratch
    `attn_ref` (group*tgt_len, D) instead of building a per-head list and
    lane-concatenating (keeps at most one head's partials live, no concat
    relayout).  The 1/sqrt(head_dim) scale is folded into Wq by the wrapper.
    """
    D = Q.shape[-1]
    hd = D // num_heads
    Qg = Q.reshape(group, tgt_len, D)
    Kg = K.reshape(group, src_len, D)
    Vg = V.reshape(group, src_len, D)

    if use_mask:
        # 2-D additive bias, hoisted out of the head loop (JAX does not CSE
        # broadcast_in_dim).  Finite -1e30 (not -inf) so a fully-masked row
        # cannot NaN through exp/reciprocal.
        row = lax.broadcasted_iota(jnp.int32, (tgt_len, src_len), 0)
        col = lax.broadcasted_iota(jnp.int32, (tgt_len, src_len), 1)
        bias = jnp.where(col <= row, jnp.float32(0.0), jnp.float32(-1e30))

    for h in range(num_heads):                      # static, short head loop
        lo = h * hd
        # Group-batched score matmul; contraction on the last dim so no
        # explicit K transpose is materialized.
        s = jnp.einsum('gtd,gsd->gts',
                       Qg[:, :, lo:lo + hd], Kg[:, :, lo:lo + hd],
                       preferred_element_type=jnp.float32)
        if use_mask:
            s = s + bias                             # implicit 2-D broadcast

        # Numerically stable softmax over the src axis (kept in f32).
        s = s - jnp.max(s, axis=-1, keepdims=True)
        p = jnp.exp(s)
        p = p * pl.reciprocal(jnp.sum(p, axis=-1, keepdims=True), approx=approx)

        o = jnp.einsum('gts,gsd->gtd',
                       p.astype(compute_dtype), Vg[:, :, lo:lo + hd],
                       preferred_element_type=jnp.float32)
        attn_ref[:, lo:lo + hd] = o.reshape(group * tgt_len, hd)


# ----------------------------------------------------------------------------
# Kernels.
# ----------------------------------------------------------------------------
def _cross_attn_kernel(q_ref, k_ref, v_ref, w_ref, b_ref, o_ref, attn_ref, *,
                       num_heads, group, tgt_len, src_len, model_dim,
                       use_mask, compute_dtype):
    D = model_dim
    cd = compute_dtype
    approx = jnp.dtype(cd) == jnp.dtype(jnp.bfloat16)

    # (group, len, D) blocks -> (group*len, D); cast once into compute dtype.
    q2 = q_ref[...].reshape(group * tgt_len, D).astype(cd)
    k2 = k_ref[...].reshape(group * src_len, D).astype(cd)
    v2 = v_ref[...].reshape(group * src_len, D).astype(cd)

    # Packed weights: w_ref = [Wq*scale | Wk | Wv | Wo] (D, 4D) in compute
    # dtype; b_ref = [bq*scale | bk | bv | bo] (1, 4D) f32.  f32 accumulation,
    # single cast to compute dtype right after each projection.
    Q = (jnp.dot(q2, w_ref[:, 0 * D:1 * D], preferred_element_type=jnp.float32)
         + b_ref[:, 0 * D:1 * D]).astype(cd)
    K = (jnp.dot(k2, w_ref[:, 1 * D:2 * D], preferred_element_type=jnp.float32)
         + b_ref[:, 1 * D:2 * D]).astype(cd)
    V = (jnp.dot(v2, w_ref[:, 2 * D:3 * D], preferred_element_type=jnp.float32)
         + b_ref[:, 2 * D:3 * D]).astype(cd)

    _mha_into_scratch(Q, K, V, attn_ref, num_heads=num_heads, group=group,
                      tgt_len=tgt_len, src_len=src_len, use_mask=use_mask,
                      compute_dtype=cd, approx=approx)

    out = (jnp.dot(attn_ref[...].astype(cd), w_ref[:, 3 * D:4 * D],
                   preferred_element_type=jnp.float32) + b_ref[:, 3 * D:4 * D])
    o_ref[...] = out.reshape(group, tgt_len, D).astype(o_ref.dtype)


def _self_attn_kernel(x_ref, w_ref, b_ref, o_ref, attn_ref, *,
                      num_heads, group, seq_len, model_dim,
                      use_mask, compute_dtype):
    D = model_dim
    cd = compute_dtype
    approx = jnp.dtype(cd) == jnp.dtype(jnp.bfloat16)

    x2 = x_ref[...].reshape(group * seq_len, D).astype(cd)

    # Fused QKV projection: one (rows, D) @ (D, 3D) MXU pass over the shared
    # activations (query is key is value) -> activations read once, 3x wider
    # N than three separate D-wide matmuls.
    qkv = (jnp.dot(x2, w_ref[:, 0:3 * D], preferred_element_type=jnp.float32)
           + b_ref[:, 0:3 * D]).astype(cd)
    Q = qkv[:, 0 * D:1 * D]
    K = qkv[:, 1 * D:2 * D]
    V = qkv[:, 2 * D:3 * D]

    _mha_into_scratch(Q, K, V, attn_ref, num_heads=num_heads, group=group,
                      tgt_len=seq_len, src_len=seq_len, use_mask=use_mask,
                      compute_dtype=cd, approx=approx)

    out = (jnp.dot(attn_ref[...].astype(cd), w_ref[:, 3 * D:4 * D],
                   preferred_element_type=jnp.float32) + b_ref[:, 3 * D:4 * D])
    o_ref[...] = out.reshape(group, seq_len, D).astype(o_ref.dtype)


# ----------------------------------------------------------------------------
# Generation-aware block sizing.
# ----------------------------------------------------------------------------
def _device_info():
    """Returns (physical VMEM bytes per TensorCore, TensorCores per chip)."""
    vmem = 64 * 1024 * 1024          # conservative default (v7x-sized VMEM)
    cores = 1
    try:
        kind = jax.devices()[0].device_kind.lower()
    except Exception:
        kind = ""
    if "v7" in kind:
        vmem, cores = 64 * 1024 * 1024, 2
    elif any(t in kind for t in ("v5 lite", "v5e", "v5litepod", "v6")):
        vmem, cores = 128 * 1024 * 1024, 1
    try:                              # authoritative when available
        vmem = int(pltpu.get_tpu_info().vmem_capacity_bytes)
    except Exception:
        pass
    return vmem, cores


def _pick_group(BT, tgt_len, src_len, D, in_item, out_item, *,
                budget_bytes, min_steps, cores):
    """Largest divisor of BT whose per-step VMEM estimate fits the budget,
    preferring groupings that give every core at least `min_steps` steps."""
    io = 2 * ((tgt_len + 2 * src_len) * D * in_item      # double-buffered in
              + tgt_len * D * out_item)                  # double-buffered out
    interm = ((tgt_len + 2 * src_len) * D * 6            # f32 proj + cd copy
              + 3 * tgt_len * src_len * 4                # scores / probs
              + 2 * tgt_len * D * 4)                     # attn scratch + temp
    per_slab = int(1.5 * (io + interm))                  # fudge factor
    cap = max(1, budget_bytes // max(per_slab, 1))

    divs = [g for g in range(1, BT + 1) if BT % g == 0]
    fit = [g for g in divs if g <= cap] or [1]
    pref = [g for g in fit if BT // g >= min_steps]
    if pref:
        balanced = [g for g in pref if (BT // g) % cores == 0]
        return max(balanced) if balanced else max(pref)
    return max(fit)


# ----------------------------------------------------------------------------
# Wrapper.
# ----------------------------------------------------------------------------
def attention_layer(query, key, value, params, *, num_heads, mask=False,
                    compute_dtype=jnp.bfloat16):
    """query: (B, T, tgt_len, D); key/value: (B, T, src_len, D).

    The kernel accepts any float dtype and casts in-VMEM; feed bf16
    activations from the producer for the lowest HBM traffic (no wrapper-side
    astype is added here on purpose -- that would cost an extra HBM pass).
    """
    B, T, tgt_len, D = query.shape
    src_len = key.shape[-2]
    assert key.shape == (B, T, src_len, D) and value.shape == (B, T, src_len, D)
    assert D % num_heads == 0
    head_dim = D // num_heads

    self_attn = (query is key) and (key is value)

    BT = B * T
    vmem_bytes, num_cores = _device_info()
    vmem_limit = int(0.75 * vmem_bytes)
    min_steps = 1 if num_cores == 1 else 2 * num_cores
    in_item = jnp.dtype(query.dtype).itemsize
    group = _pick_group(BT, tgt_len, src_len, D, in_item, in_item,
                        budget_bytes=vmem_limit // 2, min_steps=min_steps,
                        cores=num_cores)
    grid = BT // group

    # Pack the four projections into two resident operands: one (D, 4D)
    # weight (compute dtype -> half the weight DMA bytes on the bf16 path,
    # 4D lanes wide) and one (1, 4D) f32 bias.  The 1/sqrt(head_dim) scale is
    # folded into the Q projection (free).
    wq, bq, wk, bk, wv, bv, wo, bo = params
    scale = 1.0 / math.sqrt(head_dim)
    w_packed = jnp.concatenate([wq * scale, wk, wv, wo],
                               axis=-1).astype(compute_dtype)
    b_packed = jnp.concatenate(
        [jnp.ravel(bq) * scale, jnp.ravel(bk), jnp.ravel(bv), jnp.ravel(bo)],
        axis=-1).reshape(1, 4 * D).astype(jnp.float32)

    # Blocks carry `group` whole (b, t) slabs; the leading grid axis is
    # squeezed and the trailing (len, D) block dims equal the full array
    # extents, so the (8, 128) tiling constraint holds for any group and any
    # (odd) length.
    q4 = query.reshape(grid, group, tgt_len, D)
    w_spec = pl.BlockSpec((D, 4 * D), lambda i: (0, 0))
    b_spec = pl.BlockSpec((1, 4 * D), lambda i: (0, 0))
    out_spec = pl.BlockSpec((None, group, tgt_len, D), lambda i: (i, 0, 0, 0))
    out_shape = jax.ShapeDtypeStruct((grid, group, tgt_len, D), query.dtype)
    scratch = [pltpu.VMEM((group * tgt_len, D), jnp.float32)]
    cparams = pltpu.CompilerParams(dimension_semantics=("parallel",),
                                   vmem_limit_bytes=vmem_limit)

    if self_attn:
        kern = functools.partial(
            _self_attn_kernel, num_heads=num_heads, group=group,
            seq_len=tgt_len, model_dim=D, use_mask=mask,
            compute_dtype=compute_dtype)
        out = pl.pallas_call(
            kern, out_shape=out_shape,
            grid_spec=pltpu.PrefetchScalarGridSpec(
                num_scalar_prefetch=0, grid=(grid,),
                in_specs=[
                    pl.BlockSpec((None, group, tgt_len, D),
                                 lambda i: (i, 0, 0, 0)),
                    w_spec, b_spec],
                out_specs=out_spec, scratch_shapes=scratch),
            compiler_params=cparams,
        )(q4, w_packed, b_packed)
    else:
        k4 = key.reshape(grid, group, src_len, D)
        v4 = value.reshape(grid, group, src_len, D)
        kern = functools.partial(
            _cross_attn_kernel, num_heads=num_heads, group=group,
            tgt_len=tgt_len, src_len=src_len, model_dim=D, use_mask=mask,
            compute_dtype=compute_dtype)
        out = pl.pallas_call(
            kern, out_shape=out_shape,
            grid_spec=pltpu.PrefetchScalarGridSpec(
                num_scalar_prefetch=0, grid=(grid,),
                in_specs=[
                    pl.BlockSpec((None, group, tgt_len, D),
                                 lambda i: (i, 0, 0, 0)),
                    pl.BlockSpec((None, group, src_len, D),
                                 lambda i: (i, 0, 0, 0)),
                    pl.BlockSpec((None, group, src_len, D),
                                 lambda i: (i, 0, 0, 0)),
                    w_spec, b_spec],
                out_specs=out_spec, scratch_shapes=scratch),
            compiler_params=cparams,
        )(q4, k4, v4, w_packed, b_packed)

    return out.reshape(B, T, tgt_len, D)


# ----------------------------------------------------------------------------
# Pure-JAX reference mirroring the torch split/cat formulation exactly.
# ----------------------------------------------------------------------------
def attention_layer_ref(query, key, value, params, *, num_heads, mask=False):
    wq, bq, wk, bk, wv, bv, wo, bo = params
    head_dim = query.shape[-1] // num_heads

    Q = query @ wq + bq
    K = key @ wk + bk
    V = value @ wv + bv
    # torch.cat(torch.split(x, head_dim, dim=-1), dim=0)
    Q = jnp.concatenate(jnp.split(Q, num_heads, axis=-1), axis=0)
    K = jnp.concatenate(jnp.split(K, num_heads, axis=-1), axis=0)
    V = jnp.concatenate(jnp.split(V, num_heads, axis=-1), axis=0)

    s = (Q @ jnp.swapaxes(K, -1, -2)) / math.sqrt(head_dim)
    if mask:
        tgt, src = s.shape[-2], s.shape[-1]
        tri = jnp.tril(jnp.ones((tgt, src), dtype=bool))
        s = jnp.where(tri, s, -jnp.inf)
    p = jax.nn.softmax(s, axis=-1)
    out = p @ V
    # torch.cat(torch.split(out, batch_size, dim=0), dim=-1)
    out = jnp.concatenate(jnp.split(out, num_heads, axis=0), axis=-1)
    return out @ wo + bo


if __name__ == "__main__":
    # Small shapes consistent with the module:
    # (batch_size, in_steps, num_nodes/tgt_len, model_dim)
    B, T = 2, 2
    tgt_len, src_len = 16, 8
    model_dim, num_heads = 32, 4

    key0 = jax.random.PRNGKey(0)
    keys = jax.random.split(key0, 13)

    query = jax.random.normal(keys[0], (B, T, tgt_len, model_dim), jnp.float32)
    keyx = jax.random.normal(keys[1], (B, T, src_len, model_dim), jnp.float32)
    value = jax.random.normal(keys[2], (B, T, src_len, model_dim), jnp.float32)

    def lin(kw, kb):
        w = 0.1 * jax.random.normal(kw, (model_dim, model_dim), jnp.float32)
        b = 0.1 * jax.random.normal(kb, (1, model_dim), jnp.float32)
        return w, b

    wq, bq = lin(keys[3], keys[4])
    wk, bk = lin(keys[5], keys[6])
    wv, bv = lin(keys[7], keys[8])
    wo, bo = lin(keys[9], keys[10])
    params = (wq, bq, wk, bk, wv, bv, wo, bo)

    # 1) Cross-attention, f32 precision, no mask: tight match vs reference.
    out_f32 = attention_layer(query, keyx, value, params, num_heads=num_heads,
                              mask=False, compute_dtype=jnp.float32)
    out_f32 = jax.block_until_ready(out_f32)
    ref = attention_layer_ref(query, keyx, value, params,
                              num_heads=num_heads, mask=False)
    np.testing.assert_allclose(np.asarray(out_f32), np.asarray(ref),
                               rtol=1e-5, atol=1e-5)

    # 2) Cross-attention, f32 precision, causal mask.
    out_m = attention_layer(query, keyx, value, params, num_heads=num_heads,
                            mask=True, compute_dtype=jnp.float32)
    out_m = jax.block_until_ready(out_m)
    ref_m = attention_layer_ref(query, keyx, value, params,
                                num_heads=num_heads, mask=True)
    np.testing.assert_allclose(np.asarray(out_m), np.asarray(ref_m),
                               rtol=1e-5, atol=1e-5)

    # 3) Fast path: bf16 MXU operands + f32 accumulation (default).
    out_bf16 = attention_layer(query, keyx, value, params,
                               num_heads=num_heads, mask=False)
    out_bf16 = jax.block_until_ready(out_bf16)
    np.testing.assert_allclose(np.asarray(out_bf16), np.asarray(ref),
                               rtol=2e-2, atol=2e-2)

    # 4) Self-attention (query is key is value): fused-QKV kernel path.
    x = jax.random.normal(keys[11], (B, T, tgt_len, model_dim), jnp.float32)
    out_self = attention_layer(x, x, x, params, num_heads=num_heads,
                               mask=True, compute_dtype=jnp.float32)
    out_self = jax.block_until_ready(out_self)
    ref_self = attention_layer_ref(x, x, x, params,
                                   num_heads=num_heads, mask=True)
    np.testing.assert_allclose(np.asarray(out_self), np.asarray(ref_self),
                               rtol=1e-5, atol=1e-5)

    print("KERNEL_OK")
</pallas_src>

<mosaic_0001>
module attributes {stable_mosaic.version = 11 : i64} {
  func.func @_cross_attn_kernel(%arg0: i32, %arg1: memref<1x4x16x32xf32, #tpu.memory_space<vmem>>, %arg2: memref<1x4x8x32xf32, #tpu.memory_space<vmem>>, %arg3: memref<1x4x8x32xf32, #tpu.memory_space<vmem>>, %arg4: memref<32x128xf32, #tpu.memory_space<vmem>>, %arg5: memref<1x128xf32, #tpu.memory_space<vmem>>, %arg6: memref<1x4x16x32xf32, #tpu.memory_space<vmem>>, %arg7: memref<64x32xf32, #tpu.memory_space<vmem>>) attributes {dimension_semantics = [#tpu.dimension_semantics<parallel>], iteration_bounds = array<i64: 1>, scalar_prefetch = 0 : i64, scratch_operands = 1 : i64, tpu.core_type = #tpu.core_type<tc>, window_params = [{transform_indices = @transform_0, window_bounds = array<i64: 1, 4, 16, 32>}, {transform_indices = @transform_1, window_bounds = array<i64: 1, 4, 8, 32>}, {transform_indices = @transform_2, window_bounds = array<i64: 1, 4, 8, 32>}, {pipeline_mode = #tpu.pipeline_mode<synchronous>, transform_indices = @transform_3, window_bounds = array<i64: 32, 128>}, {pipeline_mode = #tpu.pipeline_mode<synchronous>, transform_indices = @transform_4, window_bounds = array<i64: 1, 128>}, {transform_indices = @transform_5, window_bounds = array<i64: 1, 4, 16, 32>}]} {
    %c0 = arith.constant 0 : index
    %c0_0 = arith.constant 0 : index
    %c0_1 = arith.constant 0 : index
    %c0_2 = arith.constant 0 : index
    %0 = vector.load %arg1[%c0, %c0_0, %c0_1, %c0_2] : memref<1x4x16x32xf32, #tpu.memory_space<vmem>>, vector<1x4x16x32xf32>
    %1 = vector.shape_cast %0 : vector<1x4x16x32xf32> to vector<4x16x32xf32>
    %2 = vector.shape_cast %1 : vector<4x16x32xf32> to vector<64x32xf32>
    %c0_3 = arith.constant 0 : index
    %c0_4 = arith.constant 0 : index
    %c0_5 = arith.constant 0 : index
    %c0_6 = arith.constant 0 : index
    %3 = vector.load %arg2[%c0_3, %c0_4, %c0_5, %c0_6] : memref<1x4x8x32xf32, #tpu.memory_space<vmem>>, vector<1x4x8x32xf32>
    %4 = vector.shape_cast %3 : vector<1x4x8x32xf32> to vector<4x8x32xf32>
    %5 = vector.shape_cast %4 : vector<4x8x32xf32> to vector<32x32xf32>
    %c0_7 = arith.constant 0 : index
    %c0_8 = arith.constant 0 : index
    %c0_9 = arith.constant 0 : index
    %c0_10 = arith.constant 0 : index
    %6 = vector.load %arg3[%c0_7, %c0_8, %c0_9, %c0_10] : memref<1x4x8x32xf32, #tpu.memory_space<vmem>>, vector<1x4x8x32xf32>
    %7 = vector.shape_cast %6 : vector<1x4x8x32xf32> to vector<4x8x32xf32>
    %8 = vector.shape_cast %7 : vector<4x8x32xf32> to vector<32x32xf32>
    %c0_11 = arith.constant 0 : index
    %c0_12 = arith.constant 0 : index
    %9 = vector.load %arg4[%c0_11, %c0_12] : memref<32x128xf32, #tpu.memory_space<vmem>>, vector<32x32xf32>
    %cst = arith.constant dense<0.000000e+00> : vector<64x32xf32>
    %10 = tpu.matmul %2, %9, %cst {dimension_numbers = #tpu.dot_dimension_numbers<[1], [0], [0], [1], [0, 0, 1, 1], [], []>} : vector<64x32xf32>, vector<32x32xf32>, vector<64x32xf32> -> vector<64x32xf32>
    %c0_13 = arith.constant 0 : index
    %c0_14 = arith.constant 0 : index
    %11 = vector.load %arg5[%c0_13, %c0_14] : memref<1x128xf32, #tpu.memory_space<vmem>>, vector<1x32xf32>
    %12 = vector.broadcast %11 : vector<1x32xf32> to vector<64x32xf32>
    %13 = arith.addf %10, %12 : vector<64x32xf32>
    %c0_15 = arith.constant 0 : index
    %c32 = arith.constant 32 : index
    %14 = vector.load %arg4[%c0_15, %c32] : memref<32x128xf32, #tpu.memory_space<vmem>>, vector<32x32xf32>
    %cst_16 = arith.constant dense<0.000000e+00> : vector<32x32xf32>
    %15 = tpu.matmul %5, %14, %cst_16 {dimension_numbers = #tpu.dot_dimension_numbers<[1], [0], [0], [1], [0, 0, 1, 1], [], []>} : vector<32x32xf32>, vector<32x32xf32>, vector<32x32xf32> -> vector<32x32xf32>
    %c0_17 = arith.constant 0 : index
    %c32_18 = arith.constant 32 : index
    %16 = vector.load %arg5[%c0_17, %c32_18] : memref<1x128xf32, #tpu.memory_space<vmem>>, vector<1x32xf32>
    %17 = vector.broadcast %16 : vector<1x32xf32> to vector<32x32xf32>
    %18 = arith.addf %15, %17 : vector<32x32xf32>
    %c0_19 = arith.constant 0 : index
    %c64 = arith.constant 64 : index
    %19 = vector.load %arg4[%c0_19, %c64] : memref<32x128xf32, #tpu.memory_space<vmem>>, vector<32x32xf32>
    %cst_20 = arith.constant dense<0.000000e+00> : vector<32x32xf32>
    %20 = tpu.matmul %8, %19, %cst_20 {dimension_numbers = #tpu.dot_dimension_numbers<[1], [0], [0], [1], [0, 0, 1, 1], [], []>} : vector<32x32xf32>, vector<32x32xf32>, vector<32x32xf32> -> vector<32x32xf32>
    %c0_21 = arith.constant 0 : index
    %c64_22 = arith.constant 64 : index
    %21 = vector.load %arg5[%c0_21, %c64_22] : memref<1x128xf32, #tpu.memory_space<vmem>>, vector<1x32xf32>
    %22 = vector.broadcast %21 : vector<1x32xf32> to vector<32x32xf32>
    %23 = arith.addf %20, %22 : vector<32x32xf32>
    %24 = vector.shape_cast %13 : vector<64x32xf32> to vector<4x16x32xf32>
    %25 = vector.shape_cast %18 : vector<32x32xf32> to vector<4x8x32xf32>
    %26 = vector.shape_cast %23 : vector<32x32xf32> to vector<4x8x32xf32>
    %27 = vector.extract_strided_slice %24 {offsets = [0, 0, 0], sizes = [4, 16, 8], strides = [1, 1, 1]} : vector<4x16x32xf32> to vector<4x16x8xf32>
    %28 = vector.extract_strided_slice %25 {offsets = [0, 0, 0], sizes = [4, 8, 8], strides = [1, 1, 1]} : vector<4x8x32xf32> to vector<4x8x8xf32>
    "tpu.trace_start"() <{level = 10 : i32, message = "gtd,gsd->gts"}> : () -> ()
    %cst_23 = arith.constant dense<0.000000e+00> : vector<4x16x8xf32>
    %29 = tpu.matmul %27, %28, %cst_23 {dimension_numbers = #tpu.dot_dimension_numbers<[2], [2], [1], [1], [0, 0, 0, 1, 1, 1], [0], [0]>} : vector<4x16x8xf32>, vector<4x8x8xf32>, vector<4x16x8xf32> -> vector<4x16x8xf32>
    "tpu.trace_stop"() : () -> ()
    %cst_24 = arith.constant dense<0xFF800000> : vector<4x16xf32>
    %30 = vector.multi_reduction <maximumf>, %29, %cst_24 [2] : vector<4x16x8xf32> to vector<4x16xf32>
    %31 = vector.shape_cast %30 : vector<4x16xf32> to vector<4x16x1xf32>
    %32 = vector.broadcast %31 : vector<4x16x1xf32> to vector<4x16x8xf32>
    %33 = arith.subf %29, %32 : vector<4x16x8xf32>
    %34 = math.exp %33 : vector<4x16x8xf32>
    %cst_25 = arith.constant dense<0.000000e+00> : vector<4x16xf32>
    %35 = vector.multi_reduction <add>, %34, %cst_25 [2] : vector<4x16x8xf32> to vector<4x16xf32>
    %36 = vector.shape_cast %35 : vector<4x16xf32> to vector<4x16x1xf32>
    %37 = tpu.reciprocal %36 : vector<4x16x1xf32> -> vector<4x16x1xf32>
    %38 = vector.broadcast %37 : vector<4x16x1xf32> to vector<4x16x8xf32>
    %39 = arith.mulf %34, %38 : vector<4x16x8xf32>
    %40 = vector.extract_strided_slice %26 {offsets = [0, 0, 0], sizes = [4, 8, 8], strides = [1, 1, 1]} : vector<4x8x32xf32> to vector<4x8x8xf32>
    "tpu.trace_start"() <{level = 10 : i32, message = "gts,gsd->gtd"}> : () -> ()
    %cst_26 = arith.constant dense<0.000000e+00> : vector<4x16x8xf32>
    %41 = tpu.matmul %39, %40, %cst_26 {dimension_numbers = #tpu.dot_dimension_numbers<[2], [1], [1], [2], [0, 0, 0, 1, 1, 2], [0], [0]>} : vector<4x16x8xf32>, vector<4x8x8xf32>, vector<4x16x8xf32> -> vector<4x16x8xf32>
    "tpu.trace_stop"() : () -> ()
    %42 = vector.shape_cast %41 : vector<4x16x8xf32> to vector<64x8xf32>
    %c0_27 = arith.constant 0 : index
    %c0_28 = arith.constant 0 : index
    %43 = vector.load %arg7[%c0_27, %c0_28] : memref<64x32xf32, #tpu.memory_space<vmem>>, vector<64x8xf32>
    tpu.vector_store %arg7[%c0_27, %c0_28], %42 {strides = array<i32>} : memref<64x32xf32, #tpu.memory_space<vmem>>, vector<64x8xf32>,
    %44 = vector.extract_strided_slice %24 {offsets = [0, 0, 8], sizes = [4, 16, 8], strides = [1, 1, 1]} : vector<4x16x32xf32> to vector<4x16x8xf32>
    %45 = vector.extract_strided_slice %25 {offsets = [0, 0, 8], sizes = [4, 8, 8], strides = [1, 1, 1]} : vector<4x8x32xf32> to vector<4x8x8xf32>
    "tpu.trace_start"() <{level = 10 : i32, message = "gtd,gsd->gts"}> : () -> ()
    %cst_29 = arith.constant dense<0.000000e+00> : vector<4x16x8xf32>
    %46 = tpu.matmul %44, %45, %cst_29 {dimension_numbers = #tpu.dot_dimension_numbers<[2], [2], [1], [1], [0, 0, 0, 1, 1, 1], [0], [0]>} : vector<4x16x8xf32>, vector<4x8x8xf32>, vector<4x16x8xf32> -> vector<4x16x8xf32>
    "tpu.trace_stop"() : () -> ()
    %cst_30 = arith.constant dense<0xFF800000> : vector<4x16xf32>
    %47 = vector.multi_reduction <maximumf>, %46, %cst_30 [2] : vector<4x16x8xf32> to vector<4x16xf32>
    %48 = vector.shape_cast %47 : vector<4x16xf32> to vector<4x16x1xf32>
    %49 = vector.broadcast %48 : vector<4x16x1xf32> to vector<4x16x8xf32>
    %50 = arith.subf %46, %49 : vector<4x16x8xf32>
    %51 = math.exp %50 : vector<4x16x8xf32>
    %cst_31 = arith.constant dense<0.000000e+00> : vector<4x16xf32>
    %52 = vector.multi_reduction <add>, %51, %cst_31 [2] : vector<4x16x8xf32> to vector<4x16xf32>
    %53 = vector.shape_cast %52 : vector<4x16xf32> to vector<4x16x1xf32>
    %54 = tpu.reciprocal %53 : vector<4x16x1xf32> -> vector<4x16x1xf32>
    %55 = vector.broadcast %54 : vector<4x16x1xf32> to vector<4x16x8xf32>
    %56 = arith.mulf %51, %55 : vector<4x16x8xf32>
    %57 = vector.extract_strided_slice %26 {offsets = [0, 0, 8], sizes = [4, 8, 8], strides = [1, 1, 1]} : vector<4x8x32xf32> to vector<4x8x8xf32>
    "tpu.trace_start"() <{level = 10 : i32, message = "gts,gsd->gtd"}> : () -> ()
    %cst_32 = arith.constant dense<0.000000e+00> : vector<4x16x8xf32>
    %58 = tpu.matmul %56, %57, %cst_32 {dimension_numbers = #tpu.dot_dimension_numbers<[2], [1], [1], [2], [0, 0, 0, 1, 1, 2], [0], [0]>} : vector<4x16x8xf32>, vector<4x8x8xf32>, vector<4x16x8xf32> -> vector<4x16x8xf32>
    "tpu.trace_stop"() : () -> ()
    %59 = vector.shape_cast %58 : vector<4x16x8xf32> to vector<64x8xf32>
    %c0_33 = arith.constant 0 : index
    %c8 = arith.constant 8 : index
    %60 = vector.load %arg7[%c0_33, %c8] : memref<64x32xf32, #tpu.memory_space<vmem>>, vector<64x8xf32>
    tpu.vector_store %arg7[%c0_33, %c8], %59 {strides = array<i32>} : memref<64x32xf32, #tpu.memory_space<vmem>>, vector<64x8xf32>,
    %61 = vector.extract_strided_slice %24 {offsets = [0, 0, 16], sizes = [4, 16, 8], strides = [1, 1, 1]} : vector<4x16x32xf32> to vector<4x16x8xf32>
    %62 = vector.extract_strided_slice %25 {offsets = [0, 0, 16], sizes = [4, 8, 8], strides = [1, 1, 1]} : vector<4x8x32xf32> to vector<4x8x8xf32>
    "tpu.trace_start"() <{level = 10 : i32, message = "gtd,gsd->gts"}> : () -> ()
    %cst_34 = arith.constant dense<0.000000e+00> : vector<4x16x8xf32>
    %63 = tpu.matmul %61, %62, %cst_34 {dimension_numbers = #tpu.dot_dimension_numbers<[2], [2], [1], [1], [0, 0, 0, 1, 1, 1], [0], [0]>} : vector<4x16x8xf32>, vector<4x8x8xf32>, vector<4x16x8xf32> -> vector<4x16x8xf32>
    "tpu.trace_stop"() : () -> ()
    %cst_35 = arith.constant dense<0xFF800000> : vector<4x16xf32>
    %64 = vector.multi_reduction <maximumf>, %63, %cst_35 [2] : vector<4x16x8xf32> to vector<4x16xf32>
    %65 = vector.shape_cast %64 : vector<4x16xf32> to vector<4x16x1xf32>
    %66 = vector.broadcast %65 : vector<4x16x1xf32> to vector<4x16x8xf32>
    %67 = arith.subf %63, %66 : vector<4x16x8xf32>
    %68 = math.exp %67 : vector<4x16x8xf32>
    %cst_36 = arith.constant dense<0.000000e+00> : vector<4x16xf32>
    %69 = vector.multi_reduction <add>, %68, %cst_36 [2] : vector<4x16x8xf32> to vector<4x16xf32>
    %70 = vector.shape_cast %69 : vector<4x16xf32> to vector<4x16x1xf32>
    %71 = tpu.reciprocal %70 : vector<4x16x1xf32> -> vector<4x16x1xf32>
    %72 = vector.broadcast %71 : vector<4x16x1xf32> to vector<4x16x8xf32>
    %73 = arith.mulf %68, %72 : vector<4x16x8xf32>
    %74 = vector.extract_strided_slice %26 {offsets = [0, 0, 16], sizes = [4, 8, 8], strides = [1, 1, 1]} : vector<4x8x32xf32> to vector<4x8x8xf32>
    "tpu.trace_start"() <{level = 10 : i32, message = "gts,gsd->gtd"}> : () -> ()
    %cst_37 = arith.constant dense<0.000000e+00> : vector<4x16x8xf32>
    %75 = tpu.matmul %73, %74, %cst_37 {dimension_numbers = #tpu.dot_dimension_numbers<[2], [1], [1], [2], [0, 0, 0, 1, 1, 2], [0], [0]>} : vector<4x16x8xf32>, vector<4x8x8xf32>, vector<4x16x8xf32> -> vector<4x16x8xf32>
    "tpu.trace_stop"() : () -> ()
    %76 = vector.shape_cast %75 : vector<4x16x8xf32> to vector<64x8xf32>
    %c0_38 = arith.constant 0 : index
    %c16 = arith.constant 16 : index
    %77 = vector.load %arg7[%c0_38, %c16] : memref<64x32xf32, #tpu.memory_space<vmem>>, vector<64x8xf32>
    tpu.vector_store %arg7[%c0_38, %c16], %76 {strides = array<i32>} : memref<64x32xf32, #tpu.memory_space<vmem>>, vector<64x8xf32>,
    %78 = vector.extract_strided_slice %24 {offsets = [0, 0, 24], sizes = [4, 16, 8], strides = [1, 1, 1]} : vector<4x16x32xf32> to vector<4x16x8xf32>
    %79 = vector.extract_strided_slice %25 {offsets = [0, 0, 24], sizes = [4, 8, 8], strides = [1, 1, 1]} : vector<4x8x32xf32> to vector<4x8x8xf32>
    "tpu.trace_start"() <{level = 10 : i32, message = "gtd,gsd->gts"}> : () -> ()
    %cst_39 = arith.constant dense<0.000000e+00> : vector<4x16x8xf32>
    %80 = tpu.matmul %78, %79, %cst_39 {dimension_numbers = #tpu.dot_dimension_numbers<[2], [2], [1], [1], [0, 0, 0, 1, 1, 1], [0], [0]>} : vector<4x16x8xf32>, vector<4x8x8xf32>, vector<4x16x8xf32> -> vector<4x16x8xf32>
    "tpu.trace_stop"() : () -> ()
    %cst_40 = arith.constant dense<0xFF800000> : vector<4x16xf32>
    %81 = vector.multi_reduction <maximumf>, %80, %cst_40 [2] : vector<4x16x8xf32> to vector<4x16xf32>
    %82 = vector.shape_cast %81 : vector<4x16xf32> to vector<4x16x1xf32>
    %83 = vector.broadcast %82 : vector<4x16x1xf32> to vector<4x16x8xf32>
    %84 = arith.subf %80, %83 : vector<4x16x8xf32>
    %85 = math.exp %84 : vector<4x16x8xf32>
    %cst_41 = arith.constant dense<0.000000e+00> : vector<4x16xf32>
    %86 = vector.multi_reduction <add>, %85, %cst_41 [2] : vector<4x16x8xf32> to vector<4x16xf32>
    %87 = vector.shape_cast %86 : vector<4x16xf32> to vector<4x16x1xf32>
    %88 = tpu.reciprocal %87 : vector<4x16x1xf32> -> vector<4x16x1xf32>
    %89 = vector.broadcast %88 : vector<4x16x1xf32> to vector<4x16x8xf32>
    %90 = arith.mulf %85, %89 : vector<4x16x8xf32>
    %91 = vector.extract_strided_slice %26 {offsets = [0, 0, 24], sizes = [4, 8, 8], strides = [1, 1, 1]} : vector<4x8x32xf32> to vector<4x8x8xf32>
    "tpu.trace_start"() <{level = 10 : i32, message = "gts,gsd->gtd"}> : () -> ()
    %cst_42 = arith.constant dense<0.000000e+00> : vector<4x16x8xf32>
    %92 = tpu.matmul %90, %91, %cst_42 {dimension_numbers = #tpu.dot_dimension_numbers<[2], [1], [1], [2], [0, 0, 0, 1, 1, 2], [0], [0]>} : vector<4x16x8xf32>, vector<4x8x8xf32>, vector<4x16x8xf32> -> vector<4x16x8xf32>
    "tpu.trace_stop"() : () -> ()
    %93 = vector.shape_cast %92 : vector<4x16x8xf32> to vector<64x8xf32>
    %c0_43 = arith.constant 0 : index
    %c24 = arith.constant 24 : index
    %94 = vector.load %arg7[%c0_43, %c24] : memref<64x32xf32, #tpu.memory_space<vmem>>, vector<64x8xf32>
    tpu.vector_store %arg7[%c0_43, %c24], %93 {strides = array<i32>} : memref<64x32xf32, #tpu.memory_space<vmem>>, vector<64x8xf32>,
    %c0_44 = arith.constant 0 : index
    %c0_45 = arith.constant 0 : index
    %95 = vector.load %arg7[%c0_44, %c0_45] : memref<64x32xf32, #tpu.memory_space<vmem>>, vector<64x32xf32>
    %c0_46 = arith.constant 0 : index
    %c96 = arith.constant 96 : index
    %96 = vector.load %arg4[%c0_46, %c96] : memref<32x128xf32, #tpu.memory_space<vmem>>, vector<32x32xf32>
    %cst_47 = arith.constant dense<0.000000e+00> : vector<64x32xf32>
    %97 = tpu.matmul %95, %96, %cst_47 {dimension_numbers = #tpu.dot_dimension_numbers<[1], [0], [0], [1], [0, 0, 1, 1], [], []>} : vector<64x32xf32>, vector<32x32xf32>, vector<64x32xf32> -> vector<64x32xf32>
    %c0_48 = arith.constant 0 : index
    %c96_49 = arith.constant 96 : index
    %98 = vector.load %arg5[%c0_48, %c96_49] : memref<1x128xf32, #tpu.memory_space<vmem>>, vector<1x32xf32>
    %99 = vector.broadcast %98 : vector<1x32xf32> to vector<64x32xf32>
    %100 = arith.addf %97, %99 : vector<64x32xf32>
    %101 = vector.shape_cast %100 : vector<64x32xf32> to vector<4x16x32xf32>
    %c0_50 = arith.constant 0 : index
    %c0_51 = arith.constant 0 : index
    %c0_52 = arith.constant 0 : index
    %c0_53 = arith.constant 0 : index
    %102 = vector.load %arg6[%c0_50, %c0_51, %c0_52, %c0_53] : memref<1x4x16x32xf32, #tpu.memory_space<vmem>>, vector<1x4x16x32xf32>
    %103 = vector.shape_cast %102 : vector<1x4x16x32xf32> to vector<4x16x32xf32>
    %104 = vector.shape_cast %101 : vector<4x16x32xf32> to vector<1x4x16x32xf32>
    tpu.vector_store %arg6[%c0_50, %c0_51, %c0_52, %c0_53], %104 {strides = array<i32>} : memref<1x4x16x32xf32, #tpu.memory_space<vmem>>, vector<1x4x16x32xf32>,
    return
  }
  func.func @transform_0(%arg0: i32) -> (i32, i32, i32, i32) {
    %c0_i32 = arith.constant 0 : i32
    %c0_i32_0 = arith.constant 0 : i32
    %c0_i32_1 = arith.constant 0 : i32
    %c0_i32_2 = arith.constant 0 : i32
    return %arg0, %c0_i32, %c0_i32_0, %c0_i32_1 : i32, i32, i32, i32
  }
  func.func @transform_1(%arg0: i32) -> (i32, i32, i32, i32) {
    %c0_i32 = arith.constant 0 : i32
    %c0_i32_0 = arith.constant 0 : i32
    %c0_i32_1 = arith.constant 0 : i32
    %c0_i32_2 = arith.constant 0 : i32
    return %arg0, %c0_i32, %c0_i32_0, %c0_i32_1 : i32, i32, i32, i32
  }
  func.func @transform_2(%arg0: i32) -> (i32, i32, i32, i32) {
    %c0_i32 = arith.constant 0 : i32
    %c0_i32_0 = arith.constant 0 : i32
    %c0_i32_1 = arith.constant 0 : i32
    %c0_i32_2 = arith.constant 0 : i32
    return %arg0, %c0_i32, %c0_i32_0, %c0_i32_1 : i32, i32, i32, i32
  }
  func.func @transform_3(%arg0: i32) -> (i32, i32) {
    %c0_i32 = arith.constant 0 : i32
    %c0_i32_0 = arith.constant 0 : i32
    %c0_i32_1 = arith.constant 0 : i32
    return %c0_i32, %c0_i32_0 : i32, i32
  }
  func.func @transform_4(%arg0: i32) -> (i32, i32) {
    %c0_i32 = arith.constant 0 : i32
    %c0_i32_0 = arith.constant 0 : i32
    %c0_i32_1 = arith.constant 0 : i32
    return %c0_i32, %c0_i32_0 : i32, i32
  }
  func.func @transform_5(%arg0: i32) -> (i32, i32, i32, i32) {
    %c0_i32 = arith.constant 0 : i32
    %c0_i32_0 = arith.constant 0 : i32
    %c0_i32_1 = arith.constant 0 : i32
    %c0_i32_2 = arith.constant 0 : i32
    return %arg0, %c0_i32, %c0_i32_0, %c0_i32_1 : i32, i32, i32, i32
  }
}

</mosaic_0001>

<bundles_post_ra>
// kernel: tpu_custom_call.1
= control target key start
LH: loop header
LB: loop body
LE: loop exit
PB: predicated region body
PF: predicated region fallthrough
CT: control target
= control target key end

     0   :  { %10 = vsyncpa [#allocation4], 0  ;;  %s3651_s0 = inlined_call_operand.hbm [shape: f32[1,4,16,32], index: 0, kind: input, shape index: {}]   ;;  %s3652_s1 = inlined_call_operand.hbm [shape: f32[1,4,8,32], index: 1, kind: input, shape index: {}]   ;;  %s3653_s2 = inlined_call_operand.hbm [shape: f32[1,4,8,32], index: 2, kind: input, shape index: {}]   ;;  %s3654_s3 = inlined_call_operand.hbm [shape: f32[32,128], index: 3, kind: input, shape index: {}]   ;;  %s3655_s4 = inlined_call_operand.vmem [shape: f32[1,128], index: 4, kind: input, shape index: {}]   ;;  %s3656_s5 = inlined_call_operand.hbm [shape: f32[1,4,16,32], index: 5, kind: output, shape index: {}]  }
   0x1   :  { %11 = vsyncpa [#allocation7], 0 }
   0x2   :  { %12 = vsyncpa [#allocation10], 0 }
   0x3   :  { %13 = vsyncpa [#allocation5], 0  ;;  %s31_s20 = sshll.u32 %s3652_s1, 4  ;;  %s2805_s21 = smov [#allocation6]   ;;  %s32_s20 = int_to_ptr.hbm [resolvable:$true] %s31_s20 }
   0x4   :  { %s33_s22 = sshll.u32 %s2805_s21, 4  ;;  %s18_s25 = sshll.u32 %s3651_s0, 4  ;;  %s34_s22 = int_to_ptr.vmem [resolvable:$true] %s33_s22  ;;  %s19_s25 = int_to_ptr.hbm [resolvable:$true] %s18_s25 }
   0x5   :  { %s2806_s26 = smov 128   ;;  %s2807_s27 = smov 8  }
   0x6   :  { %39 = dma.hbm_to_vmem [thread:$0]  %s32_s20, 512, %s34_s22, [#allocation7], %s2806_s26, %s2806_s26, %s2807_s27  }
   0x7   :  { %s2808_s28 = smov [#allocation3]   ;;  %s44_s1 = sshll.u32 %s3653_s2, 4  ;;  %s45_s1 = int_to_ptr.hbm [resolvable:$true] %s44_s1 }
   0x8   :  { %s20_s29 = sshll.u32 %s2808_s28, 4  ;;  %s57_s8 = sshll.u32 %s3654_s3, 4  ;;  %s21_s29 = int_to_ptr.vmem [resolvable:$true] %s20_s29  ;;  %s58_s8 = int_to_ptr.hbm [resolvable:$true] %s57_s8 }
   0x9   :  { %26 = dma.hbm_to_vmem [thread:$0]  %s19_s25, 1024, %s21_s29, [#allocation4], %s2806_s26, %s2806_s26, %s2807_s27  }
   0xa   :  { %s2809_s9 = smov [#allocation8]   ;;  %s2810_s11 = smov [#allocation9]  }
   0xb   :  { %s46_s10 = sshll.u32 %s2809_s9, 4  ;;  %s59_s2 = sshll.u32 %s2810_s11, 4  ;;  %s47_s10 = int_to_ptr.vmem [resolvable:$true] %s46_s10  ;;  %s60_s2 = int_to_ptr.vmem [resolvable:$true] %s59_s2 }
   0xc   :  { %52 = dma.hbm_to_vmem [thread:$0]  %s45_s1, 512, %s47_s10, [#allocation7], %s2806_s26, %s2806_s26, %s2807_s27  }
   0xd   :  { %65 = dma.hbm_to_vmem [thread:$0]  %s58_s8, 512, %s60_s2, [#allocation10], %s2806_s26, %s2806_s26, %s2807_s27  }
   0xe   :  { %2797 = dma.done.wait [#allocation4], 1024  }
   0xf   :  { %2798 = vsyncadd [#allocation4], 4294966272 }
  0x10   :  { %2799 = dma.done.wait [#allocation7], 1024  }
  0x11   :  { %2800 = vsyncadd [#allocation7], 4294966272 }
  0x12   :  { %2801 = dma.done.wait [#allocation10], 512  }
  0x13   :  { %2802 = vsyncadd [#allocation10], 4294966784  ;;  %v102_v0 = vld [vmem:[#allocation9 + $0x10] sm:$0xff]  ;;  %v103_v1 = vld [vmem:[#allocation9 + $0x18] sm:$0xff]  ;;  %s2811_s3 = smov 96   ;;  %vm108_vm0 = vcmask 261120  }
  0x14   :  { %v2874_v2 = vpack.i.bf16 %v102_v0, %v103_v1  ;;  %2474 = vmatpush.msra.mxu1 %v103_v1  ;;  %145 = vmatpush.msra.mxu0 %v103_v1  ;;  %v100_v3 = vld [vmem:[#allocation9] sm:$0xff]  ;;  %v101_v4 = vld [vmem:[#allocation9 + $0x8] sm:$0xff]  ;;  %v86_v10 = vld [vmem:[#allocation3 + $0x10] sm:$0xff]  ;;  %vm290_vm1 = vcmask 64512   ;;  %s2812_s14 = smov 64   ;;  %s2813_s15 = smov 120  }
  0x15   :  { %2475 = vmatpush.msra.mxu2 %v103_v1  ;;  %v2507_v5 = vpack.i.bf16 %v100_v3, %v101_v4  ;;  %v89_v6 = vld [vmem:[#allocation3 + $0x28] sm:$0xff]  ;;  %v84_v7 = vld [vmem:[#allocation3] sm:$0xff]  ;;  %v87_v11 = vld [vmem:[#allocation3 + $0x18] sm:$0xff]  ;;  %s2814_s16 = smov 112   ;;  %s2815_s17 = smov 104  }
  0x16   :  { %2503 = vrot.lane.b32.xlu0 %v2874_v2, %s2811_s3  ;;  %2476 = vmatpush.msra.mxu1 %v102_v0  ;;  %v85_v8 = vld [vmem:[#allocation3 + $0x8] sm:$0xff]  ;;  %v2883_v9 = vld [vmem:[%s3655_s4] ss:$0 sm:$0xff]  ;;  %v90_v12 = vld [vmem:[#allocation3 + $0x30] sm:$0xff]  ;;  %s2816_s18 = smov 32   ;;  %s2817_s19 = smov 16  }
  0x17   :  { %146 = vmatpush.msra.mxu0 %v102_v0  ;;  %2477 = vmatpush.msra.mxu2 %v102_v0  ;;  %v88_v16 = vld [vmem:[#allocation3 + $0x20] sm:$0xff]  ;;  %v91_v17 = vld [vmem:[#allocation3 + $0x38] sm:$0xff]  ;;  %v93_v22 = vld [vmem:[#allocation6 + $0x8] sm:$0xff]  ;;  %s2818_s20 = smov 24   ;;  %s2355_s28 = sshll.u32 %s3656_s5, 4  ;;  %s2356_s28 = int_to_ptr.hbm [resolvable:$true] %s2355_s28 }
  0x18   :  { %2478 = vmatpush.msra.mxu1 %v101_v4  ;;  %190 = vrot.lane.b32.xlu1 %v2883_v9, %s2811_s3  ;;  %v92_v21 = vld [vmem:[#allocation6] sm:$0xff]  ;;  %v94_v23 = vld [vmem:[#allocation6 + $0x10] sm:$0xff]  ;;  %v95_v24 = vld [vmem:[#allocation6 + $0x18] sm:$0xff] }
  0x19   :  { %147 = vmatpush.msra.mxu0 %v101_v4  ;;  %2479 = vmatpush.msra.mxu2 %v101_v4  ;;  %v96_v57 = vld [vmem:[#allocation8] sm:$0xff]  ;;  %v97_v61 = vld [vmem:[#allocation8 + $0x8] sm:$0xff] }
  0x1a   :  { %2480 = vmatpush.msra.mxu1 %v100_v3  ;;  %2518 = vrot.lane.b32.xlu2 %v2507_v5, %s2812_s14 }
  0x1b   :  { %148 = vmatpush.msra.mxu0 %v100_v3  ;;  %2481 = vmatpush.msra.mxu2 %v100_v3 }
  0x1c   :  { %2375 = vmatmul.msk.f32.vlgmr.msra.gmra.mxu1 %vm108_vm0, %v89_v6  ;;  %2370 = vmatmul.msk.f32.vlgmr.msra.gmra.mxu0 %vm108_vm0, %v84_v7  ;;  %v98_v6 = vld [vmem:[#allocation8 + $0x10] sm:$0xff] }
  0x1d   :  { %2376 = vmatmul.msk.f32.vlgmr.msra.gmra.mxu2 %vm108_vm0, %v90_v12 }
  0x1e   :  { %2508 = vrot.lane.b32.xlu0 %v2507_v5, %s2811_s3 }
  0x20   :  { %2513 = vrot.lane.b32.xlu1 %v2874_v2, %s2812_s14 }
  0x24   :  { %2371 = vmatmul.msk.f32.gmra.mxu0 %vm108_vm0, %v85_v8 }
  0x25   :  { %2377 = vmatmul.msk.f32.gmra.mxu2 %vm108_vm0, %v91_v17 }
  0x2c   :  { %2372 = vmatmul.msk.f32.gmra.mxu0 %vm108_vm0, %v86_v10  ;;  %v99_v10 = vld [vmem:[#allocation8 + $0x18] sm:$0xff] }
  0x34   :  { %2373 = vmatmul.msk.f32.gmra.mxu0 %vm108_vm0, %v87_v11 }
  0x3c   :  { %2374 = vmatmul.msk.f32.gmra.mxu0 %vm108_vm0, %v88_v16 }
  0x74   :  { %v2519_v52 = vpop.permute.xlu2 %2518 }
  0x75   :  { %v2520_v54 = vunpack.i.l.bf16 %v2519_v52  ;;  %v2521_v55 = vunpack.i.h.bf16 %v2519_v52 }
  0x88   :  { %v2504_v13 = vpop.permute.xlu0 %2503 }
  0x89   :  { %v2505_v14 = vunpack.i.l.bf16 %v2504_v13  ;;  %v2506_v15 = vunpack.i.h.bf16 %v2504_v13 }
  0x8a   :  { %v191_v28 = vpop.permute.xlu1 %190 }
  0x8b   :  { %217 = vmatpush.msrb.mxu1 %v2505_v14 }
  0x8d   :  { %218 = vmatpush.msrb.mxu1 %v2506_v15 }
  0x90   :  { %v2509_v18 = vpop.permute.xlu0 %2508 }
  0x91   :  { %v2510_v19 = vunpack.i.l.bf16 %v2509_v18  ;;  %v2511_v20 = vunpack.i.h.bf16 %v2509_v18 }
  0x92   :  { %v2514_v50 = vpop.permute.xlu1 %2513 }
  0x93   :  { %219 = vmatpush.msrb.mxu1 %v2510_v19  ;;  %v2515_v51 = vunpack.i.l.bf16 %v2514_v50  ;;  %v2516_v53 = vunpack.i.h.bf16 %v2514_v50 }
  0x95   :  { %220 = vmatpush.msrb.mxu1 %v2511_v20  ;;  %273 = vmatpush.msrb.mxu2 %v2515_v51 }
  0x96   :  { %2378 = vmatmul.msk.f32.vlgmr.msrb.gmra.mxu1 %vm108_vm0, %v92_v21 }
  0x97   :  { %274 = vmatpush.msrb.mxu2 %v2516_v53 }
  0x99   :  { %v150_v25 = vpop.f32.mrf.mxu0  ;;  %v165_v26 = vpop.f32.mrf.mxu1  ;;  %275 = vmatpush.msrb.mxu2 %v2520_v54 }
  0x9a   :  { %v2905_v33 = vadd.f32 %v2883_v9, %v150_v25  ;;  %v2950_v49 = vadd.f32 %v2883_v9, %v165_v26 }
  0x9b   :  { %276 = vmatpush.msrb.mxu2 %v2521_v55 }
  0x9c   :  { %2382 = vmatmul.msk.f32.vlgmr.msrb.gmra.mxu2 %vm108_vm0, %v96_v57 }
  0x9e   :  { %2379 = vmatmul.msk.f32.gmra.mxu1 %vm108_vm0, %v93_v22 }
  0xa0   :  { %v168_v41 = vpop.f32.mrf.mxu2 }
  0xa1   :  { %v153_v27 = vpop.f32.mrf.mxu0  ;;  %v2938_v46 = vadd.f32 %v2883_v9, %v168_v41 }
  0xa2   :  { %v2898_v31 = vadd.f32 %v2883_v9, %v153_v27 }
  0xa4   :  { %2383 = vmatmul.msk.f32.gmra.mxu2 %vm108_vm0, %v97_v61 }
  0xa6   :  { %2380 = vmatmul.msk.f32.gmra.mxu1 %vm108_vm0, %v94_v23 }
  0xa8   :  { %v171_v47 = vpop.f32.mrf.mxu2 }
  0xa9   :  { %v156_v32 = vpop.f32.mrf.mxu0  ;;  %v2947_v48 = vadd.f32 %v2883_v9, %v171_v47 }
  0xaa   :  { %v2917_v36 = vadd.f32 %v2883_v9, %v156_v32 }
  0xac   :  { %2384 = vmatmul.msk.f32.gmra.mxu2 %vm108_vm0, %v98_v6 }
  0xae   :  { %2381 = vmatmul.msk.f32.gmra.mxu1 %vm108_vm0, %v95_v24 }
  0xb1   :  { %v159_v37 = vpop.f32.mrf.mxu0 }
  0xb2   :  { %v2926_v40 = vadd.f32 %v2883_v9, %v159_v37 }
  0xb4   :  { %2385 = vmatmul.msk.f32.gmra.mxu2 %vm108_vm0, %v99_v10 }
  0xb9   :  { %v162_v42 = vpop.f32.mrf.mxu0 }
  0xba   :  { %v2935_v45 = vadd.f32 %v2883_v9, %v162_v42 }
 0x113   :  { %v222_v29 = vpop.f32.mrf.mxu1 }
 0x114   :  { %v2895_v30 = vadd.f32 %v222_v29, %v191_v28 }
 0x116   :  { %2386 = vmatpush.xpose.msk.msra.mxu1 %vm290_vm1, %v2895_v30  ;;  %2482 = vmatpush.xpose.msk.msra.mxu3 %vm290_vm1, %v2895_v30 }
 0x119   :  { %2387 = vmatmul.msk.f32.vlgmr.msra.gmra.mxu1 %vm290_vm1, %v2905_v33  ;;  %2388 = vmatmul.msk.f32.vlgmr.msra.gmra.mxu3 %vm290_vm1, %v2898_v31 }
 0x11b   :  { %v225_v34 = vpop.f32.mrf.mxu1 }
 0x11c   :  { %v2914_v35 = vadd.f32 %v225_v34, %v191_v28 }
 0x11e   :  { %2389 = vmatpush.xpose.msk.msrb.mxu3 %vm290_vm1, %v2914_v35 }
 0x11f   :  { %v278_v37 = vpop.f32.mrf.mxu2 }
 0x121   :  { %2390 = vmatmul.msk.f32.vlgmr.msrb.gmra.mxu3 %vm290_vm1, %v2917_v36 }
 0x123   :  { %v228_v38 = vpop.f32.mrf.mxu1 }
 0x124   :  { %v2923_v39 = vadd.f32 %v228_v38, %v191_v28 }
 0x126   :  { %2392 = vmatpush.xpose.msk.msra.mxu3 %vm290_vm1, %v2923_v39 }
 0x127   :  { %v281_v52 = vpop.f32.mrf.mxu2 }
 0x129   :  { %2391 = vmatmul.msk.f32.gmra.mxu3 %vm290_vm1, %v2926_v40 }
 0x12b   :  { %v231_v43 = vpop.f32.mrf.mxu1 }
 0x12c   :  { %v2932_v44 = vadd.f32 %v231_v43, %v191_v28 }
 0x12e   :  { %2395 = vmatpush.xpose.msk.msrb.mxu1 %vm290_vm1, %v2932_v44 }
 0x12f   :  { %v284_v57 = vpop.f32.mrf.mxu2 }
 0x131   :  { %2393 = vmatmul.msk.f32.vlgmr.msra.gmra.mxu3 %vm290_vm1, %v2935_v45  ;;  %2396 = vmatmul.msk.f32.vlgmr.msrb.gmra.mxu1 %vm290_vm1, %v2938_v46 }
 0x137   :  { %v287_v61 = vpop.f32.mrf.mxu2 }
 0x139   :  { %2394 = vmatmul.msk.f32.gmra.mxu3 %vm290_vm1, %v2950_v49  ;;  %2397 = vmatmul.msk.f32.gmra.mxu1 %vm290_vm1, %v2947_v48 }
 0x196   :  { %v317_v56 = vpop.f32.mrf.mxu1 }
 0x197   :  { %v419_v58 = vsel %vm290_vm1, %v317_v56, -inf }
 0x198   :  { %420 = vmax.xlane.f32.xlu0 %v419_v58 }
 0x19c   :  { %v320_v59 = vpop.f32.mrf.mxu3 }
 0x19d   :  { %v422_v60 = vsel %vm290_vm1, %v320_v59, -inf }
 0x19e   :  { %423 = vmax.xlane.f32.xlu2 %v422_v60 }
 0x1a4   :  { %v349_v62 = vpop.f32.mrf.mxu3 }
 0x1a5   :  { %v425_v63 = vsel %vm290_vm1, %v349_v62, -inf }
 0x1a6   :  { %426 = vmax.xlane.f32.xlu2 %v425_v63 }
 0x1ac   :  { %v352_v0 = vpop.f32.mrf.mxu3 }
 0x1ad   :  { %v428_v1 = vsel %vm290_vm1, %v352_v0, -inf }
 0x1ae   :  { %429 = vmax.xlane.f32.xlu1 %v428_v1  ;;  %v413_v2 = vpop.f32.mrf.mxu1 }
 0x1af   :  { %v437_v3 = vsel %vm290_vm1, %v413_v2, -inf }
 0x1b0   :  { %438 = vmax.xlane.f32.xlu2 %v437_v3 }
 0x1b4   :  { %v2963_v4 = vpop.f32.mrf.mxu3 }
 0x1b5   :  { %v431_v5 = vsel %vm290_vm1, %v2963_v4, -inf }
 0x1b6   :  { %432 = vmax.xlane.f32.xlu0 %v431_v5  ;;  %v416_v7 = vpop.f32.mrf.mxu1 }
 0x1b7   :  { %v440_v8 = vsel %vm290_vm1, %v416_v7, -inf }
 0x1b8   :  { %441 = vmax.xlane.f32.xlu1 %v440_v8 }
 0x1bc   :  { %v384_v11 = vpop.f32.mrf.mxu3 }
 0x1bd   :  { %v434_v12 = vsel %vm290_vm1, %v384_v11, -inf }
 0x1be   :  { %435 = vmax.xlane.f32.xlu2 %v434_v12 }
 0x1ca   :  { %739 = vrot.lane.b32.xlu0 %v2895_v30, %s2813_s15 }
 0x1d1   :  { %246 = vrot.lane.b32.xlu1 %v2883_v9, %s2812_s14 }
 0x1d6   :  { %737 = vrot.lane.b32.xlu2 %v2898_v31, %s2813_s15 }
 0x20b   :  { %v421_v13 = vpop.xlane.xlu0 %420 }
 0x20c   :  { %v443_v14 = vsub.f32 %v317_v56, %v421_v13 }
 0x20e   :  { %v451_v15 = vmul.f32 1.442695, %v443_v14 }
 0x210   :  { %2549 = vpow2.f32 %v451_v15 }
 0x211   :  { %v424_v16 = vpop.xlane.xlu2 %423 }
 0x212   :  { %v444_v17 = vsub.f32 %v320_v59, %v424_v16 }
 0x214   :  { %v453_v18 = vmul.f32 1.442695, %v444_v17 }
 0x216   :  { %v2977_v19 = vpop.eup %2549  ;;  %2551 = vpow2.f32 %v453_v18 }
 0x217   :  { %v467_v20 = vsel %vm290_vm1, %v2977_v19, 0.0 }
 0x218   :  { %468 = vadd.xlane.f32.xlu1 %v467_v20 }
 0x219   :  { %v427_v21 = vpop.xlane.xlu2 %426 }
 0x21a   :  { %v445_v22 = vsub.f32 %v349_v62, %v427_v21 }
 0x21c   :  { %v2981_v9 = vpop.eup %2551  ;;  %v455_v23 = vmul.f32 1.442695, %v445_v22 }
 0x21d   :  { %v470_v24 = vsel %vm290_vm1, %v2981_v9, 0.0 }
 0x21e   :  { %2553 = vpow2.f32 %v455_v23  ;;  %471 = vadd.xlane.f32.xlu0 %v470_v24 }
 0x221   :  { %v430_v25 = vpop.xlane.xlu1 %429 }
 0x222   :  { %v446_v26 = vsub.f32 %v352_v0, %v430_v25 }
 0x223   :  { %v439_v27 = vpop.xlane.xlu2 %438 }
 0x224   :  { %v2985_v28 = vpop.eup %2553  ;;  %v457_v29 = vmul.f32 1.442695, %v446_v26  ;;  %v449_v32 = vsub.f32 %v413_v2, %v439_v27 }
 0x225   :  { %v473_v34 = vsel %vm290_vm1, %v2985_v28, 0.0 }
 0x226   :  { %2555 = vpow2.f32 %v457_v29  ;;  %474 = vadd.xlane.f32.xlu0 %v473_v34  ;;  %v463_v38 = vmul.f32 1.442695, %v449_v32 }
 0x228   :  { %2557 = vpow2.f32 %v463_v38 }
 0x229   :  { %v433_v60 = vpop.xlane.xlu0 %432 }
 0x22b   :  { %v442_v41 = vpop.xlane.xlu1 %441 }
 0x22c   :  { %v2989_v42 = vpop.eup %2555  ;;  %v450_v43 = vsub.f32 %v416_v7, %v442_v41  ;;  %v447_v7 = vsub.f32 %v2963_v4, %v433_v60 }
 0x22d   :  { %v476_v47 = vsel %vm290_vm1, %v2989_v42, 0.0 }
 0x22e   :  { %477 = vadd.xlane.f32.xlu2 %v476_v47  ;;  %v465_v50 = vmul.f32 1.442695, %v450_v43  ;;  %v2995_v53 = vpop.eup %2557  ;;  %v459_v8 = vmul.f32 1.442695, %v447_v7 }
 0x22f   :  { %v485_v55 = vsel %vm290_vm1, %v2995_v53, 0.0 }
 0x230   :  { %2559 = vpow2.f32 %v465_v50 }
 0x231   :  { %v436_v51 = vpop.xlane.xlu2 %435  ;;  %735 = vrot.lane.b32.xlu1 %v2905_v33, %s2813_s15 }
 0x232   :  { %v448_v54 = vsub.f32 %v384_v11, %v436_v51 }
 0x234   :  { %v461_v56 = vmul.f32 1.442695, %v448_v54 }
 0x236   :  { %486 = vadd.xlane.f32.xlu2 %v485_v55  ;;  %v3001_v58 = vpop.eup %2559  ;;  %2561 = vpow2.f32 %v461_v56 }
 0x237   :  { %v488_v59 = vsel %vm290_vm1, %v3001_v58, 0.0  ;;  %2563 = vpow2.f32 %v459_v8 }
 0x239   :  { %844 = vrot.lane.b32.xlu1 %v2932_v44, %s2813_s15  ;;  %v3046_v22 = vpop.permute.xlu2 %737 }
 0x23a   :  { %840 = vrot.lane.b32.xlu0 %v2938_v46, %s2813_s15 }
 0x23c   :  { %v3009_v62 = vpop.eup %2561  ;;  %v740_v6 = vpop.permute.xlu0 %739 }
 0x23d   :  { %v482_v5 = vsel %vm290_vm1, %v3009_v62, 0.0  ;;  %v3033_v10 = vpop.eup %2563 }
 0x23e   :  { %489 = vadd.xlane.f32.xlu2 %v488_v59  ;;  %v479_v11 = vsel %vm290_vm1, %v3033_v10, 0.0 }
 0x241   :  { %809 = vrot.lane.b32.xlu1 %v2923_v39, %s2813_s15 }
 0x243   :  { %v247_v63 = vpop.permute.xlu1 %246 }
 0x244   :  { %v3011_v0 = vadd.f32 %v278_v37, %v247_v63  ;;  %v3013_v1 = vadd.f32 %v281_v52, %v247_v63  ;;  %v3015_v2 = vadd.f32 %v284_v57, %v247_v63  ;;  %v3017_v3 = vadd.f32 %v287_v61, %v247_v63 }
 0x246   :  { %483 = vadd.xlane.f32.xlu2 %v482_v5  ;;  %661 = vmatpush.msrb.mxu3 %v3013_v1  ;;  %v2522_v12 = vpack.i.bf16 %v3017_v3, %v3011_v0 }
 0x247   :  { %632 = vmatpush.msra.mxu2 %v3011_v0  ;;  %690 = vmatpush.msra.mxu1 %v3015_v2 }
 0x248   :  { %2406 = vmatpush.xpose.msk.msra.mxu3 %vm290_vm1, %v740_v6 }
 0x249   :  { %719 = vmatpush.msrb.mxu2 %v3017_v3  ;;  %842 = vrot.lane.b32.xlu1 %v2947_v48, %s2813_s15 }
 0x251   :  { %770 = vrot.lane.b32.xlu1 %v2917_v36, %s2813_s15 }
 0x25e   :  { %774 = vrot.lane.b32.xlu2 %v2914_v35, %s2813_s15 }
 0x264   :  { %480 = vadd.xlane.f32.xlu0 %v479_v11 }
 0x278   :  { %805 = vrot.lane.b32.xlu0 %v2935_v45, %s2813_s15 }
 0x280   :  { %807 = vrot.lane.b32.xlu0 %v2950_v49, %s2813_s15 }
 0x288   :  { %772 = vrot.lane.b32.xlu0 %v2926_v40, %s2813_s15 }
 0x28b   :  { %v469_v4 = vpop.xlane.xlu1 %468 }
 0x28c   :  { %2565 = vrcp.f32 %v469_v4  ;;  %v502_v17 = vand.u32 2147483648, %v469_v4  ;;  %v500_v20 = vand.u32 2147483647, %v469_v4  ;;  %vm496_vm3 = vweird.f32 %v469_v4 }
 0x28e   :  { %v503_v26 = vor.u32 1.1754944e-38, %v502_v17  ;;  %vm501_vm5 = vcmp.eq.f32.partialorder %v500_v20, 8.507059e+37 }
 0x290   :  { %2523 = vrot.lane.b32.xlu0 %v2522_v12, %s2813_s15 }
 0x291   :  { %v472_v13 = vpop.xlane.xlu0 %471 }
 0x292   :  { %v2566_v14 = vpop.eup %2565  ;;  %2567 = vrcp.f32 %v472_v13  ;;  %v516_v34 = vand.u32 2147483648, %v472_v13  ;;  %v514_v41 = vand.u32 2147483647, %v472_v13  ;;  %vm510_vm7 = vweird.f32 %v472_v13 }
 0x293   :  { %v492_v15 = vmul.f32 %v2566_v14, %v469_v4  ;;  %vm497_vm2 = vweird.f32 %v2566_v14 }
 0x294   :  { %vm498_vm4 = vmor %vm496_vm3, %vm497_vm2  ;;  %v517_v50 = vor.u32 1.1754944e-38, %v516_v34  ;;  %vm515_vm9 = vcmp.eq.f32.partialorder %v514_v41, 8.507059e+37 }
 0x295   :  { %v493_v16 = vsub.f32 1.0, %v492_v15 }
 0x297   :  { %v494_v18 = vmul.f32 %v2566_v14, %v493_v16 }
 0x298   :  { %v2568_v21 = vpop.eup %2567 }
 0x299   :  { %v495_v23 = vadd.f32 %v2566_v14, %v494_v18  ;;  %v506_v24 = vmul.f32 %v2568_v21, %v472_v13  ;;  %v475_v25 = vpop.xlane.xlu0 %474  ;;  %vm511_vm6 = vweird.f32 %v2568_v21 }
 0x29a   :  { %2569 = vrcp.f32 %v475_v25  ;;  %vm512_vm8 = vmor %vm510_vm7, %vm511_vm6  ;;  %v530_v59 = vand.u32 2147483648, %v475_v25  ;;  %v528_v60 = vand.u32 2147483647, %v475_v25  ;;  %vm524_vm11 = vweird.f32 %v475_v25 }
 0x29b   :  { %v499_v27 = vsel %vm498_vm4, %v2566_v14, %v495_v23  ;;  %v507_v29 = vsub.f32 1.0, %v506_v24 }
 0x29c   :  { %v504_v32 = vsel %vm501_vm5, %v503_v26, %v499_v27  ;;  %v531_v6 = vor.u32 1.1754944e-38, %v530_v59  ;;  %vm529_vm13 = vcmp.eq.f32.partialorder %v528_v60, 8.507059e+37 }
 0x29d   :  { %v508_v37 = vmul.f32 %v2568_v21, %v507_v29  ;;  %v603_v38 = vmul.f32 %v2977_v19, %v504_v32 }
 0x29f   :  { %2398 = vmatmul.msk.f32.vlgmr.msra.gmra.mxu2 %vm290_vm1, %v603_v38  ;;  %v509_v43 = vadd.f32 %v2568_v21, %v508_v37 }
 0x2a0   :  { %v2570_v47 = vpop.eup %2569 }
 0x2a1   :  { %v520_v51 = vmul.f32 %v2570_v47, %v475_v25  ;;  %v478_v52 = vpop.xlane.xlu2 %477  ;;  %v513_v54 = vsel %vm512_vm8, %v2568_v21, %v509_v43  ;;  %vm525_vm10 = vweird.f32 %v2570_v47 }
 0x2a2   :  { %2571 = vrcp.f32 %v478_v52  ;;  %v518_v55 = vsel %vm515_vm9, %v517_v50, %v513_v54  ;;  %vm526_vm12 = vmor %vm524_vm11, %vm525_vm10  ;;  %v544_v15 = vand.u32 2147483648, %v478_v52  ;;  %v542_v16 = vand.u32 2147483647, %v478_v52 }
 0x2a3   :  { %v521_v56 = vsub.f32 1.0, %v520_v51  ;;  %v3050_v57 = vpop.permute.xlu1 %735  ;;  %v604_v61 = vmul.f32 %v2981_v9, %v518_v55  ;;  %vm538_vm15 = vweird.f32 %v478_v52 }
 0x2a4   :  { %v545_v20 = vor.u32 1.1754944e-38, %v544_v15  ;;  %vm543_vm3 = vcmp.eq.f32.partialorder %v542_v16, 8.507059e+37 }
 0x2a5   :  { %v522_v19 = vmul.f32 %v2570_v47, %v521_v56 }
 0x2a7   :  { %v523_v63 = vadd.f32 %v2570_v47, %v522_v19  ;;  %2399 = vmatmul.msk.f32.gmra.mxu2 %vm290_vm1, %v604_v61 }
 0x2a8   :  { %v2572_v5 = vpop.eup %2571 }
 0x2a9   :  { %v527_v7 = vsel %vm526_vm12, %v2570_v47, %v523_v63  ;;  %v534_v8 = vmul.f32 %v2572_v5, %v478_v52  ;;  %v487_v11 = vpop.xlane.xlu2 %486  ;;  %vm539_vm14 = vweird.f32 %v2572_v5 }
 0x2aa   :  { %v532_v4 = vsel %vm529_vm13, %v531_v6, %v527_v7  ;;  %2573 = vrcp.f32 %v487_v11  ;;  %vm540_vm2 = vmor %vm538_vm15, %vm539_vm14  ;;  %v586_v29 = vand.u32 2147483648, %v487_v11  ;;  %v584_v34 = vand.u32 2147483647, %v487_v11 }
 0x2ab   :  { %v535_v12 = vsub.f32 1.0, %v534_v8  ;;  %v845_v13 = vpop.permute.xlu1 %844  ;;  %v605_v14 = vmul.f32 %v2985_v28, %v532_v4  ;;  %vm580_vm5 = vweird.f32 %v487_v11 }
 0x2ac   :  { %2415 = vmatpush.xpose.msk.msra.mxu2 %vm290_vm1, %v845_v13  ;;  %v587_v41 = vor.u32 1.1754944e-38, %v586_v29  ;;  %vm585_vm7 = vcmp.eq.f32.partialorder %v584_v34, 8.507059e+37 }
 0x2ad   :  { %v536_v9 = vmul.f32 %v2572_v5, %v535_v12  ;;  %2400 = vmatmul.msk.f32.vlgmr.msrb.gmra.mxu3 %vm290_vm1, %v605_v14 }
 0x2af   :  { %v537_v17 = vadd.f32 %v2572_v5, %v536_v9 }
 0x2b0   :  { %v2574_v18 = vpop.eup %2573 }
 0x2b1   :  { %v576_v21 = vmul.f32 %v2574_v18, %v487_v11  ;;  %v490_v23 = vpop.xlane.xlu2 %489  ;;  %v541_v24 = vsel %vm540_vm2, %v2572_v5, %v537_v17  ;;  %vm581_vm4 = vweird.f32 %v2574_v18 }
 0x2b2   :  { %2575 = vrcp.f32 %v490_v23  ;;  %v546_v25 = vsel %vm543_vm3, %v545_v20, %v541_v24  ;;  %vm582_vm6 = vmor %vm580_vm5, %vm581_vm4  ;;  %v600_v55 = vand.u32 2147483648, %v490_v23  ;;  %v598_v59 = vand.u32 2147483647, %v490_v23 }
 0x2b3   :  { %v577_v28 = vsub.f32 1.0, %v576_v21  ;;  %v810_v26 = vpop.permute.xlu1 %809  ;;  %v606_v27 = vmul.f32 %v2989_v42, %v546_v25  ;;  %vm594_vm9 = vweird.f32 %v490_v23 }
 0x2b4   :  { %2412 = vmatpush.xpose.msk.msrb.mxu1 %vm290_vm1, %v810_v26  ;;  %v601_v60 = vor.u32 1.1754944e-38, %v600_v55  ;;  %vm599_vm11 = vcmp.eq.f32.partialorder %v598_v59, 8.507059e+37 }
 0x2b5   :  { %v578_v32 = vmul.f32 %v2574_v18, %v577_v28  ;;  %2401 = vmatmul.msk.f32.gmra.mxu3 %vm290_vm1, %v606_v27 }
 0x2b7   :  { %v579_v37 = vadd.f32 %v2574_v18, %v578_v32 }
 0x2b8   :  { %v2576_v38 = vpop.eup %2575 }
 0x2b9   :  { %v583_v43 = vsel %vm582_vm6, %v2574_v18, %v579_v37  ;;  %v590_v47 = vmul.f32 %v2576_v38, %v490_v23  ;;  %v484_v50 = vpop.xlane.xlu2 %483  ;;  %vm595_vm8 = vweird.f32 %v2576_v38 }
 0x2ba   :  { %v588_v51 = vsel %vm585_vm7, %v587_v41, %v583_v43  ;;  %vm596_vm10 = vmor %vm594_vm9, %vm595_vm8  ;;  %2577 = vrcp.f32 %v484_v50  ;;  %v572_v21 = vand.u32 2147483648, %v484_v50  ;;  %vm566_vm3 = vweird.f32 %v484_v50 }
 0x2bb   :  { %v591_v52 = vsub.f32 1.0, %v590_v47  ;;  %v843_v42 = vpop.permute.xlu1 %842  ;;  %v609_v54 = vmul.f32 %v2995_v53, %v588_v51  ;;  %v570_v25 = vand.u32 2147483647, %v484_v50 }
 0x2bc   :  { %v573_v27 = vor.u32 1.1754944e-38, %v572_v21 }
 0x2bd   :  { %v592_v56 = vmul.f32 %v2576_v38, %v591_v52  ;;  %2404 = vmatmul.msk.f32.vlgmr.msrb.gmra.mxu2 %vm290_vm1, %v609_v54  ;;  %2407 = vmatmul.msk.f32.vlgmr.msra.gmra.mxu3 %vm290_vm1, %v3050_v57  ;;  %v841_v57 = vpop.permute.xlu0 %840  ;;  %vm571_vm5 = vcmp.eq.f32.partialorder %v570_v25, 8.507059e+37 }
 0x2bf   :  { %v593_v19 = vadd.f32 %v2576_v38, %v592_v56 }
 0x2c0   :  { %v2578_v8 = vpop.eup %2577 }
 0x2c1   :  { %v775_v61 = vpop.permute.xlu2 %774  ;;  %v597_v63 = vsel %vm596_vm10, %v2576_v38, %v593_v19  ;;  %v562_v11 = vmul.f32 %v2578_v8, %v484_v50  ;;  %vm567_vm2 = vweird.f32 %v2578_v8 }
 0x2c2   :  { %2409 = vmatpush.xpose.msk.msrb.mxu0 %vm290_vm1, %v775_v61  ;;  %v602_v5 = vsel %vm599_vm11, %v601_v60, %v597_v63  ;;  %vm568_vm4 = vmor %vm566_vm3, %vm567_vm2 }
 0x2c3   :  { %v771_v53 = vpop.permute.xlu1 %770  ;;  %v610_v6 = vmul.f32 %v3001_v58, %v602_v5  ;;  %v563_v12 = vsub.f32 1.0, %v562_v11 }
 0x2c5   :  { %2405 = vmatmul.msk.f32.gmra.mxu2 %vm290_vm1, %v610_v6  ;;  %2408 = vmatmul.msk.f32.gmra.mxu3 %vm290_vm1, %v3046_v22  ;;  %v564_v15 = vmul.f32 %v2578_v8, %v563_v12 }
 0x2c6   :  { %2410 = vmatmul.msk.f32.vlgmr.msrb.gmra.mxu0 %vm290_vm1, %v771_v53 }
 0x2c7   :  { %v565_v20 = vadd.f32 %v2578_v8, %v564_v15 }
 0x2c9   :  { %v569_v26 = vsel %vm568_vm4, %v2578_v8, %v565_v20 }
 0x2ca   :  { %v574_v29 = vsel %vm571_vm5, %v573_v27, %v569_v26 }
 0x2cb   :  { %v608_v32 = vmul.f32 %v3009_v62, %v574_v29 }
 0x2cd   :  { %2416 = vmatmul.msk.f32.vlgmr.msra.gmra.mxu2 %vm290_vm1, %v841_v57 }
 0x2d5   :  { %2417 = vmatmul.msk.f32.gmra.mxu2 %vm290_vm1, %v843_v42 }
 0x2d7   :  { %v481_v7 = vpop.xlane.xlu0 %480 }
 0x2d8   :  { %2579 = vrcp.f32 %v481_v7  ;;  %v558_v14 = vand.u32 2147483648, %v481_v7  ;;  %v556_v22 = vand.u32 2147483647, %v481_v7  ;;  %vm552_vm13 = vweird.f32 %v481_v7 }
 0x2da   :  { %v559_v17 = vor.u32 1.1754944e-38, %v558_v14  ;;  %vm557_vm15 = vcmp.eq.f32.partialorder %v556_v22, 8.507059e+37 }
 0x2de   :  { %v2580_v4 = vpop.eup %2579 }
 0x2df   :  { %v548_v58 = vmul.f32 %v2580_v4, %v481_v7  ;;  %vm553_vm12 = vweird.f32 %v2580_v4 }
 0x2e0   :  { %vm554_vm14 = vmor %vm552_vm13, %vm553_vm12 }
 0x2e1   :  { %v549_v13 = vsub.f32 1.0, %v548_v58 }
 0x2e3   :  { %v550_v9 = vmul.f32 %v2580_v4, %v549_v13 }
 0x2e5   :  { %v551_v16 = vadd.f32 %v2580_v4, %v550_v9 }
 0x2e7   :  { %v555_v18 = vsel %vm554_vm14, %v2580_v4, %v551_v16 }
 0x2e8   :  { %v560_v23 = vsel %vm557_vm15, %v559_v17, %v555_v18 }
 0x2e9   :  { %v607_v24 = vmul.f32 %v3033_v10, %v560_v23 }
 0x2ea   :  { %v806_v28 = vpop.permute.xlu0 %805 }
 0x2eb   :  { %2402 = vmatmul.msk.f32.vlgmr.msra.gmra.mxu1 %vm290_vm1, %v607_v24 }
 0x2f2   :  { %v808_v34 = vpop.permute.xlu0 %807 }
 0x2f3   :  { %2403 = vmatmul.msk.f32.gmra.mxu1 %vm290_vm1, %v608_v32 }
 0x2fa   :  { %v773_v37 = vpop.permute.xlu0 %772 }
 0x2fb   :  { %2411 = vmatmul.msk.f32.gmra.mxu0 %vm290_vm1, %v773_v37  ;;  %2413 = vmatmul.msk.f32.vlgmr.msrb.gmra.mxu1 %vm290_vm1, %v806_v28 }
 0x302   :  { %v2524_v10 = vpop.permute.xlu0 %2523 }
 0x303   :  { %v2526_v38 = vunpack.i.h.bf16 %v2524_v10  ;;  %v2525_v41 = vunpack.i.l.bf16 %v2524_v10  ;;  %2414 = vmatmul.msk.f32.gmra.mxu1 %vm290_vm1, %v808_v34 }
 0x305   :  { %1092 = vmatpush.msrb.mxu3 %v2525_v41  ;;  %1191 = vmatpush.msrb.mxu2 %v2526_v38 }
 0x322   :  { %v634_v43 = vpop.f32.mrf.mxu2 }
 0x323   :  { %727 = vst.msk [vmem:[#allocation2] sm:$0xff] %vm290_vm1, %v634_v43 }
 0x32a   :  { %v637_v47 = vpop.f32.mrf.mxu2 }
 0x32b   :  { %728 = vst.msk [vmem:[#allocation2 + $0x8] sm:$0xff] %vm290_vm1, %v637_v47 }
 0x330   :  { %v663_v62 = vpop.f32.mrf.mxu3 }
 0x331   :  { %729 = vst.msk [vmem:[#allocation2 + $0x10] sm:$0xff] %vm290_vm1, %v663_v62 }
 0x338   :  { %v666_v50 = vpop.f32.mrf.mxu3 }
 0x339   :  { %730 = vst.msk [vmem:[#allocation2 + $0x18] sm:$0xff] %vm290_vm1, %v666_v50 }
 0x340   :  { %v721_v51 = vpop.f32.mrf.mxu2  ;;  %v764_v6 = vpop.f32.mrf.mxu3 }
 0x341   :  { %733 = vst.msk [vmem:[#allocation2 + $0x30] sm:$0xff] %vm290_vm1, %v721_v51  ;;  %v875_v15 = vsel %vm290_vm1, %v764_v6, -inf }
 0x343   :  { %v799_v52 = vpop.f32.mrf.mxu0 }
 0x344   :  { %v881_v42 = vsel %vm290_vm1, %v799_v52, -inf }
 0x345   :  { %882 = vmax.xlane.f32.xlu2 %v881_v42 }
 0x348   :  { %v724_v54 = vpop.f32.mrf.mxu2  ;;  %v767_v7 = vpop.f32.mrf.mxu3 }
 0x349   :  { %734 = vst.msk [vmem:[#allocation2 + $0x38] sm:$0xff] %vm290_vm1, %v724_v54  ;;  %v878_v4 = vsel %vm290_vm1, %v767_v7, -inf }
 0x350   :  { %v869_v55 = vpop.f32.mrf.mxu2 }
 0x351   :  { %v893_v56 = vsel %vm290_vm1, %v869_v55, -inf }
 0x352   :  { %894 = vmax.xlane.f32.xlu0 %v893_v56 }
 0x358   :  { %v872_v12 = vpop.f32.mrf.mxu2 }
 0x359   :  { %v896_v14 = vsel %vm290_vm1, %v872_v12, -inf }
 0x368   :  { %v692_v59 = vpop.f32.mrf.mxu1 }
 0x369   :  { %731 = vst.msk [vmem:[#allocation2 + $0x20] sm:$0xff] %vm290_vm1, %v692_v59 }
 0x370   :  { %v695_v19 = vpop.f32.mrf.mxu1 }
 0x371   :  { %732 = vst.msk [vmem:[#allocation2 + $0x28] sm:$0xff] %vm290_vm1, %v695_v19 }
 0x378   :  { %v3089_v60 = vpop.f32.mrf.mxu0  ;;  %v3091_v61 = vpop.f32.mrf.mxu1 }
 0x379   :  { %v884_v63 = vsel %vm290_vm1, %v3089_v60, -inf  ;;  %v887_v9 = vsel %vm290_vm1, %v3091_v61, -inf }
 0x37a   :  { %885 = vmax.xlane.f32.xlu1 %v884_v63 }
 0x380   :  { %v3095_v5 = vpop.f32.mrf.mxu1 }
 0x381   :  { %v890_v53 = vsel %vm290_vm1, %v3095_v5, -inf }
 0x382   :  { %891 = vmax.xlane.f32.xlu0 %v890_v53 }
 0x393   :  { %1244 = vrot.lane.b32.xlu1 %v2895_v30, %s2814_s16 }
 0x3b8   :  { %v883_v57 = vpop.xlane.xlu2 %882 }
 0x3b9   :  { %v901_v8 = vsub.f32 %v799_v52, %v883_v57 }
 0x3bb   :  { %v911_v11 = vmul.f32 1.442695, %v901_v8 }
 0x3bd   :  { %2581 = vpow2.f32 %v911_v11  ;;  %879 = vmax.xlane.f32.xlu1 %v878_v4 }
 0x3c3   :  { %v3102_v58 = vpop.eup %2581 }
 0x3c4   :  { %v929_v13 = vsel %vm290_vm1, %v3102_v58, 0.0 }
 0x3c5   :  { %930 = vadd.xlane.f32.xlu2 %v929_v13  ;;  %897 = vmax.xlane.f32.xlu1 %v896_v14  ;;  %v895_v17 = vpop.xlane.xlu0 %894 }
 0x3c6   :  { %v905_v18 = vsub.f32 %v869_v55, %v895_v17 }
 0x3c8   :  { %v919_v20 = vmul.f32 1.442695, %v905_v18 }
 0x3ca   :  { %2583 = vpow2.f32 %v919_v20 }
 0x3cd   :  { %876 = vmax.xlane.f32.xlu2 %v875_v15 }
 0x3d0   :  { %v3127_v21 = vpop.eup %2583 }
 0x3d1   :  { %v941_v23 = vsel %vm290_vm1, %v3127_v21, 0.0 }
 0x3d5   :  { %888 = vmax.xlane.f32.xlu2 %v887_v9 }
 0x3de   :  { %1242 = vrot.lane.b32.xlu1 %v2898_v31, %s2814_s16 }
 0x3e6   :  { %1349 = vrot.lane.b32.xlu1 %v2932_v44, %s2814_s16 }
 0x3ed   :  { %1134 = vrot.lane.b32.xlu2 %v3015_v2, %s2813_s15  ;;  %v3122_v22 = vpop.xlane.xlu1 %885 }
 0x3ee   :  { %1314 = vrot.lane.b32.xlu1 %v2923_v39, %s2814_s16 }
 0x3f5   :  { %1101 = vrot.lane.b32.xlu2 %v3013_v1, %s2813_s15  ;;  %v892_v52 = vpop.xlane.xlu0 %891 }
 0x3f6   :  { %1310 = vrot.lane.b32.xlu1 %v2935_v45, %s2814_s16  ;;  %v904_v59 = vsub.f32 %v3095_v5, %v892_v52 }
 0x3fd   :  { %1345 = vrot.lane.b32.xlu2 %v2938_v46, %s2814_s16 }
 0x405   :  { %v1245_v16 = vpop.permute.xlu1 %1244 }
 0x406   :  { %2426 = vmatpush.xpose.msk.msra.mxu3 %vm290_vm1, %v1245_v16 }
 0x420   :  { %942 = vadd.xlane.f32.xlu1 %v941_v23 }
 0x430   :  { %v880_v24 = vpop.xlane.xlu1 %879 }
 0x431   :  { %v900_v25 = vsub.f32 %v767_v7, %v880_v24 }
 0x433   :  { %v909_v28 = vmul.f32 1.442695, %v900_v25 }
 0x435   :  { %2585 = vpow2.f32 %v909_v28 }
 0x438   :  { %v931_v26 = vpop.xlane.xlu2 %930  ;;  %v898_v27 = vpop.xlane.xlu1 %897 }
 0x439   :  { %2587 = vrcp.f32 %v931_v26  ;;  %v906_v29 = vsub.f32 %v872_v12, %v898_v27  ;;  %v986_v57 = vand.u32 2147483648, %v931_v26  ;;  %vm980_vm7 = vweird.f32 %v931_v26 }
 0x43a   :  { %v984_v7 = vand.u32 2147483647, %v931_v26 }
 0x43b   :  { %v3131_v32 = vpop.eup %2585  ;;  %v921_v34 = vmul.f32 1.442695, %v906_v29  ;;  %v987_v5 = vor.u32 1.1754944e-38, %v986_v57 }
 0x43c   :  { %v926_v37 = vsel %vm290_vm1, %v3131_v32, 0.0  ;;  %vm985_vm9 = vcmp.eq.f32.partialorder %v984_v7, 8.507059e+37 }
 0x43d   :  { %927 = vadd.xlane.f32.xlu2 %v926_v37  ;;  %2589 = vpow2.f32 %v921_v34 }
 0x43f   :  { %v2588_v10 = vpop.eup %2587 }
 0x440   :  { %v877_v38 = vpop.xlane.xlu2 %876  ;;  %v976_v43 = vmul.f32 %v2588_v10, %v931_v26  ;;  %vm981_vm6 = vweird.f32 %v2588_v10 }
 0x441   :  { %v899_v41 = vsub.f32 %v764_v6, %v877_v38  ;;  %v917_v6 = vmul.f32 1.442695, %v904_v59  ;;  %vm982_vm8 = vmor %vm980_vm7, %vm981_vm6 }
 0x442   :  { %v977_v51 = vsub.f32 1.0, %v976_v43 }
 0x443   :  { %v907_v47 = vmul.f32 1.442695, %v899_v41  ;;  %v3135_v62 = vpop.eup %2589 }
 0x444   :  { %v944_v50 = vsel %vm290_vm1, %v3135_v62, 0.0  ;;  %v978_v55 = vmul.f32 %v2588_v10, %v977_v51 }
 0x445   :  { %2591 = vpow2.f32 %v907_v47  ;;  %945 = vadd.xlane.f32.xlu1 %v944_v50 }
 0x446   :  { %v979_v53 = vadd.f32 %v2588_v10, %v978_v55 }
 0x448   :  { %v889_v42 = vpop.xlane.xlu2 %888 }
 0x449   :  { %v903_v54 = vsub.f32 %v3091_v61, %v889_v42  ;;  %v983_v61 = vsel %vm982_vm8, %v2588_v10, %v979_v53 }
 0x44a   :  { %v988_v13 = vsel %vm985_vm9, %v987_v5, %v983_v61 }
 0x44b   :  { %v3140_v56 = vpop.eup %2591  ;;  %v915_v19 = vmul.f32 1.442695, %v903_v54  ;;  %v1061_v9 = vmul.f32 %v3102_v58, %v988_v13  ;;  %v902_v58 = vsub.f32 %v3089_v60, %v3122_v22 }
 0x44c   :  { %v923_v63 = vsel %vm290_vm1, %v3140_v56, 0.0 }
 0x44d   :  { %2593 = vpow2.f32 %v915_v19  ;;  %924 = vadd.xlane.f32.xlu0 %v923_v63  ;;  %v913_v20 = vmul.f32 1.442695, %v902_v58 }
 0x44e   :  { %2595 = vpow2.f32 %v917_v6 }
 0x44f   :  { %2597 = vpow2.f32 %v913_v20 }
 0x450   :  { %v1135_v8 = vpop.permute.xlu2 %1134  ;;  %v3145_v11 = vpop.permute.xlu1 %1242 }
 0x451   :  { %1158 = vmatpush.msra.mxu1 %v1135_v8 }
 0x453   :  { %v3147_v4 = vpop.eup %2593 }
 0x454   :  { %v935_v12 = vsel %vm290_vm1, %v3147_v4, 0.0  ;;  %v3152_v16 = vpop.eup %2595 }
 0x455   :  { %936 = vadd.xlane.f32.xlu2 %v935_v12  ;;  %v938_v17 = vsel %vm290_vm1, %v3152_v16, 0.0  ;;  %v3171_v23 = vpop.eup %2597 }
 0x456   :  { %v932_v24 = vsel %vm290_vm1, %v3171_v23, 0.0 }
 0x458   :  { %v1102_v14 = vpop.permute.xlu2 %1101  ;;  %v1350_v15 = vpop.permute.xlu1 %1349 }
 0x459   :  { %1125 = vmatpush.msra.mxu0 %v1102_v14  ;;  %2435 = vmatpush.xpose.msk.msra.mxu2 %vm290_vm1, %v1350_v15 }
 0x45a   :  { %2420 = vmatmul.msk.f32.vlgmr.msra.gmra.mxu0 %vm290_vm1, %v1061_v9 }
 0x45d   :  { %939 = vadd.xlane.f32.xlu2 %v938_v17 }
 0x45e   :  { %1279 = vrot.lane.b32.xlu1 %v2914_v35, %s2814_s16 }
 0x460   :  { %v1315_v18 = vpop.permute.xlu1 %1314  ;;  %v3181_v47 = vpop.permute.xlu2 %1345 }
 0x461   :  { %1240 = vrot.lane.b32.xlu0 %v2905_v33, %s2814_s16  ;;  %2432 = vmatpush.xpose.msk.msrb.mxu1 %vm290_vm1, %v1315_v18 }
 0x466   :  { %1277 = vrot.lane.b32.xlu1 %v2926_v40, %s2814_s16 }
 0x468   :  { %v3175_v25 = vpop.permute.xlu1 %1310 }
 0x475   :  { %1347 = vrot.lane.b32.xlu2 %v2947_v48, %s2814_s16 }
 0x47d   :  { %1275 = vrot.lane.b32.xlu2 %v2917_v36, %s2814_s16 }
 0x48b   :  { %933 = vadd.xlane.f32.xlu0 %v932_v24 }
 0x493   :  { %v943_v28 = vpop.xlane.xlu1 %942 }
 0x494   :  { %2599 = vrcp.f32 %v943_v28  ;;  %v1042_v34 = vand.u32 2147483648, %v943_v28  ;;  %v1040_v22 = vand.u32 2147483647, %v943_v28  ;;  %vm1036_vm11 = vweird.f32 %v943_v28 }
 0x496   :  { %v1043_v10 = vor.u32 1.1754944e-38, %v1042_v34  ;;  %vm1041_vm13 = vcmp.eq.f32.partialorder %v1040_v22, 8.507059e+37 }
 0x49a   :  { %v2600_v26 = vpop.eup %2599 }
 0x49b   :  { %v1032_v27 = vmul.f32 %v2600_v26, %v943_v28  ;;  %vm1037_vm10 = vweird.f32 %v2600_v26 }
 0x49c   :  { %vm1038_vm12 = vmor %vm1036_vm11, %vm1037_vm10 }
 0x49d   :  { %v1033_v29 = vsub.f32 1.0, %v1032_v27 }
 0x49f   :  { %v1034_v60 = vmul.f32 %v2600_v26, %v1033_v29  ;;  %1312 = vrot.lane.b32.xlu0 %v2950_v49, %s2814_s16 }
 0x4a1   :  { %v1035_v37 = vadd.f32 %v2600_v26, %v1034_v60 }
 0x4a3   :  { %v1039_v38 = vsel %vm1038_vm12, %v2600_v26, %v1035_v37 }
 0x4a4   :  { %v1044_v41 = vsel %vm1041_vm13, %v1043_v10, %v1039_v38 }
 0x4a5   :  { %v1065_v43 = vmul.f32 %v3127_v21, %v1044_v41 }
 0x4a7   :  { %2424 = vmatmul.msk.f32.vlgmr.msrb.gmra.mxu2 %vm290_vm1, %v1065_v43 }
 0x4b0   :  { %v3183_v50 = vpop.xlane.xlu2 %927 }
 0x4b1   :  { %2601 = vrcp.f32 %v3183_v50  ;;  %v972_v60 = vand.u32 2147483648, %v3183_v50  ;;  %vm966_vm9 = vweird.f32 %v3183_v50  ;;  %v970_v38 = vand.u32 2147483647, %v3183_v50 }
 0x4b3   :  { %vm971_vm13 = vcmp.eq.f32.partialorder %v970_v38, 8.507059e+37 }
 0x4b7   :  { %v3186_v52 = vpop.eup %2601 }
 0x4b8   :  { %v946_v51 = vpop.xlane.xlu1 %945  ;;  %v962_v59 = vmul.f32 %v3186_v52, %v3183_v50  ;;  %vm967_vm7 = vweird.f32 %v3186_v52 }
 0x4b9   :  { %2603 = vrcp.f32 %v946_v51  ;;  %v1056_v63 = vand.u32 2147483648, %v946_v51  ;;  %v1054_v53 = vand.u32 2147483647, %v946_v51  ;;  %vm1050_vm15 = vweird.f32 %v946_v51  ;;  %vm968_vm10 = vmor %vm966_vm9, %vm967_vm7 }
 0x4ba   :  { %v963_v57 = vsub.f32 1.0, %v962_v59 }
 0x4bb   :  { %v1057_v5 = vor.u32 1.1754944e-38, %v1056_v63  ;;  %vm1055_vm3 = vcmp.eq.f32.partialorder %v1054_v53, 8.507059e+37 }
 0x4bc   :  { %v964_v14 = vmul.f32 %v3186_v52, %v963_v57 }
 0x4be   :  { %v965_v34 = vadd.f32 %v3186_v52, %v964_v14 }
 0x4bf   :  { %v2604_v42 = vpop.eup %2603 }
 0x4c0   :  { %v925_v54 = vpop.xlane.xlu0 %924  ;;  %v1046_v55 = vmul.f32 %v2604_v42, %v946_v51  ;;  %vm1051_vm14 = vweird.f32 %v2604_v42 }
 0x4c1   :  { %2605 = vrcp.f32 %v925_v54  ;;  %vm1052_vm2 = vmor %vm1050_vm15, %vm1051_vm14  ;;  %v958_v15 = vand.u32 2147483648, %v925_v54  ;;  %v956_v18 = vand.u32 2147483647, %v925_v54  ;;  %vm952_vm5 = vweird.f32 %v925_v54 }
 0x4c2   :  { %v1047_v21 = vsub.f32 1.0, %v1046_v55 }
 0x4c3   :  { %v959_v28 = vor.u32 1.1754944e-38, %v958_v15  ;;  %vm957_vm8 = vcmp.eq.f32.partialorder %v956_v18, 8.507059e+37 }
 0x4c4   :  { %v1048_v19 = vmul.f32 %v2604_v42, %v1047_v21 }
 0x4c6   :  { %v1049_v7 = vadd.f32 %v2604_v42, %v1048_v19 }
 0x4c7   :  { %v2606_v6 = vpop.eup %2605 }
 0x4c8   :  { %v948_v8 = vmul.f32 %v2606_v6, %v925_v54  ;;  %v937_v61 = vpop.xlane.xlu2 %936  ;;  %v1053_v13 = vsel %vm1052_vm2, %v2604_v42, %v1049_v7  ;;  %vm953_vm4 = vweird.f32 %v2606_v6  ;;  %v969_v42 = vsel %vm968_vm10, %v3186_v52, %v965_v34 }
 0x4c9   :  { %2607 = vrcp.f32 %v937_v61  ;;  %v1058_v9 = vsel %vm1055_vm3, %v1057_v5, %v1053_v13  ;;  %vm954_vm6 = vmor %vm952_vm5, %vm953_vm4  ;;  %v1014_v41 = vand.u32 2147483648, %v937_v61  ;;  %v1012_v51 = vand.u32 2147483647, %v937_v61 }
 0x4ca   :  { %v949_v12 = vsub.f32 1.0, %v948_v8  ;;  %v1066_v58 = vmul.f32 %v3135_v62, %v1058_v9  ;;  %v973_v54 = vor.u32 1.1754944e-38, %v972_v60  ;;  %vm1008_vm12 = vweird.f32 %v937_v61 }
 0x4cb   :  { %v1015_v50 = vor.u32 1.1754944e-38, %v1014_v41  ;;  %vm1013_vm15 = vcmp.eq.f32.partialorder %v1012_v51, 8.507059e+37 }
 0x4cc   :  { %v950_v17 = vmul.f32 %v2606_v6, %v949_v12  ;;  %2425 = vmatmul.msk.f32.gmra.mxu2 %vm290_vm1, %v1066_v58  ;;  %v974_v59 = vsel %vm971_vm13, %v973_v54, %v969_v42 }
 0x4ce   :  { %v951_v20 = vadd.f32 %v2606_v6, %v950_v17 }
 0x4cf   :  { %v2608_v24 = vpop.eup %2607 }
 0x4d0   :  { %v955_v26 = vsel %vm954_vm6, %v2606_v6, %v951_v20  ;;  %v1004_v27 = vmul.f32 %v2608_v24, %v937_v61  ;;  %v940_v29 = vpop.xlane.xlu2 %939  ;;  %v1280_v62 = vpop.permute.xlu1 %1279  ;;  %vm1009_vm11 = vweird.f32 %v2608_v24  ;;  %v1060_v6 = vmul.f32 %v3131_v32, %v974_v59 }
 0x4d1   :  { %v960_v22 = vsel %vm957_vm8, %v959_v28, %v955_v26  ;;  %2609 = vrcp.f32 %v940_v29  ;;  %2429 = vmatpush.xpose.msk.msrb.mxu0 %vm290_vm1, %v1280_v62  ;;  %vm1010_vm14 = vmor %vm1008_vm12, %vm1009_vm11  ;;  %v1028_v57 = vand.u32 2147483648, %v940_v29  ;;  %vm1022_vm3 = vweird.f32 %v940_v29 }
 0x4d2   :  { %v1005_v37 = vsub.f32 1.0, %v1004_v27  ;;  %v1059_v10 = vmul.f32 %v3140_v56, %v960_v22 }
 0x4d3   :  { %v1029_v5 = vor.u32 1.1754944e-38, %v1028_v57  ;;  %v1241_v13 = vpop.permute.xlu0 %1240 }
 0x4d4   :  { %v1006_v43 = vmul.f32 %v2608_v24, %v1005_v37  ;;  %2418 = vmatmul.msk.f32.vlgmr.msrb.gmra.mxu3 %vm290_vm1, %v1059_v10  ;;  %2436 = vmatmul.msk.f32.vlgmr.msra.gmra.mxu2 %vm290_vm1, %v3181_v47  ;;  %v1026_v47 = vand.u32 2147483647, %v940_v29 }
 0x4d6   :  { %v1007_v55 = vadd.f32 %v2608_v24, %v1006_v43  ;;  %vm1027_vm5 = vcmp.eq.f32.partialorder %v1026_v47, 8.507059e+37 }
 0x4d7   :  { %v2610_v56 = vpop.eup %2609 }
 0x4d8   :  { %v1011_v21 = vsel %vm1010_vm14, %v2608_v24, %v1007_v55  ;;  %v1018_v19 = vmul.f32 %v2610_v56, %v940_v29  ;;  %vm1023_vm2 = vweird.f32 %v2610_v56  ;;  %v1348_v8 = vpop.permute.xlu2 %1347  ;;  %v1278_v29 = vpop.permute.xlu1 %1277 }
 0x4d9   :  { %v1016_v63 = vsel %vm1013_vm15, %v1015_v50, %v1011_v21  ;;  %vm1024_vm4 = vmor %vm1022_vm3, %vm1023_vm2 }
 0x4da   :  { %v1019_v53 = vsub.f32 1.0, %v1018_v19  ;;  %v1063_v52 = vmul.f32 %v3147_v4, %v1016_v63  ;;  %v3252_v63 = vpack.i.bf16 %v3015_v2, %v3011_v0 }
 0x4dc   :  { %v1020_v7 = vmul.f32 %v2610_v56, %v1019_v53  ;;  %2419 = vmatmul.msk.f32.gmra.mxu3 %vm290_vm1, %v1060_v6  ;;  %2422 = vmatmul.msk.f32.vlgmr.msra.gmra.mxu1 %vm290_vm1, %v1063_v52 }
 0x4dd   :  { %2437 = vmatmul.msk.f32.gmra.mxu2 %vm290_vm1, %v1348_v8 }
 0x4de   :  { %v1021_v61 = vadd.f32 %v2610_v56, %v1020_v7 }
 0x4e0   :  { %v1025_v12 = vsel %vm1024_vm4, %v2610_v56, %v1021_v61 }
 0x4e1   :  { %v1030_v32 = vsel %vm1027_vm5, %v1029_v5, %v1025_v12 }
 0x4e2   :  { %v1064_v4 = vmul.f32 %v3152_v16, %v1030_v32 }
 0x4e4   :  { %2423 = vmatmul.msk.f32.gmra.mxu1 %vm290_vm1, %v1064_v4  ;;  %2427 = vmatmul.msk.f32.vlgmr.msra.gmra.mxu3 %vm290_vm1, %v1241_v13 }
 0x4ec   :  { %2428 = vmatmul.msk.f32.gmra.mxu3 %vm290_vm1, %v3145_v11  ;;  %2433 = vmatmul.msk.f32.vlgmr.msrb.gmra.mxu1 %vm290_vm1, %v3175_v25  ;;  %v1276_v25 = vpop.permute.xlu2 %1275 }
 0x4fe   :  { %v934_v14 = vpop.xlane.xlu0 %933 }
 0x4ff   :  { %2611 = vrcp.f32 %v934_v14  ;;  %v1000_v18 = vand.u32 2147483648, %v934_v14  ;;  %v998_v16 = vand.u32 2147483647, %v934_v14  ;;  %vm994_vm7 = vweird.f32 %v934_v14 }
 0x501   :  { %v1001_v24 = vor.u32 1.1754944e-38, %v1000_v18  ;;  %vm999_vm9 = vcmp.eq.f32.partialorder %v998_v16, 8.507059e+37 }
 0x505   :  { %v2612_v15 = vpop.eup %2611 }
 0x506   :  { %v990_v9 = vmul.f32 %v2612_v15, %v934_v14  ;;  %vm995_vm6 = vweird.f32 %v2612_v15 }
 0x507   :  { %vm996_vm8 = vmor %vm994_vm7, %vm995_vm6 }
 0x508   :  { %v991_v17 = vsub.f32 1.0, %v990_v9 }
 0x50a   :  { %v992_v58 = vmul.f32 %v2612_v15, %v991_v17 }
 0x50c   :  { %v993_v20 = vadd.f32 %v2612_v15, %v992_v58 }
 0x50e   :  { %v997_v28 = vsel %vm996_vm8, %v2612_v15, %v993_v20 }
 0x50f   :  { %v1002_v26 = vsel %vm999_vm9, %v1001_v24, %v997_v28 }
 0x510   :  { %v1062_v11 = vmul.f32 %v3171_v23, %v1002_v26  ;;  %v3230_v23 = vpop.f32.mrf.mxu0 }
 0x511   :  { %v1313_v27 = vpop.permute.xlu0 %1312 }
 0x512   :  { %2421 = vmatmul.msk.f32.gmra.mxu0 %vm290_vm1, %v1062_v11  ;;  %2434 = vmatmul.msk.f32.gmra.mxu1 %vm290_vm1, %v1313_v27 }
 0x51a   :  { %2430 = vmatmul.msk.f32.vlgmr.msrb.gmra.mxu0 %vm290_vm1, %v1276_v25 }
 0x522   :  { %2431 = vmatmul.msk.f32.gmra.mxu0 %vm290_vm1, %v1278_v29 }
 0x52a   :  { %v3236_v38 = vpop.f32.mrf.mxu2 }
 0x54f   :  { %v3241_v42 = vpop.f32.mrf.mxu2 }
 0x557   :  { %v3223_v34 = vpop.f32.mrf.mxu3  ;;  %v1374_v50 = vpop.f32.mrf.mxu2 }
 0x558   :  { %v1398_v59 = vsel %vm290_vm1, %v1374_v50, -inf }
 0x559   :  { %v3232_v37 = vpop.f32.mrf.mxu1 }
 0x55f   :  { %v3225_v60 = vpop.f32.mrf.mxu3 }
 0x560   :  { %v1377_v21 = vpop.f32.mrf.mxu2 }
 0x561   :  { %v3238_v41 = vpop.f32.mrf.mxu1  ;;  %v1401_v19 = vsel %vm290_vm1, %v1377_v21, -inf }
 0x567   :  { %v1269_v22 = vpop.f32.mrf.mxu3 }
 0x568   :  { %v1380_v62 = vsel %vm290_vm1, %v1269_v22, -inf }
 0x569   :  { %1381 = vmax.xlane.f32.xlu2 %v1380_v62  ;;  %v1339_v54 = vpop.f32.mrf.mxu1 }
 0x56f   :  { %v3272_v12 = vpop.f32.mrf.mxu3 }
 0x570   :  { %v1383_v4 = vsel %vm290_vm1, %v3272_v12, -inf }
 0x581   :  { %1745 = vrot.lane.b32.xlu2 %v2895_v30, %s2815_s17  ;;  %v1392_v30 = vsel %vm290_vm1, %v1339_v54, -inf }
 0x58f   :  { %v3234_v10 = vpop.f32.mrf.mxu0 }
 0x597   :  { %v1304_v43 = vpop.f32.mrf.mxu0 }
 0x598   :  { %v1386_v51 = vsel %vm290_vm1, %v1304_v43, -inf }
 0x599   :  { %1387 = vmax.xlane.f32.xlu0 %v1386_v51 }
 0x59f   :  { %v3243_v55 = vpop.f32.mrf.mxu0 }
 0x5a0   :  { %v1389_v56 = vsel %vm290_vm1, %v3243_v55, -inf }
 0x5a1   :  { %1393 = vmax.xlane.f32.xlu0 %v1392_v30  ;;  %1390 = vmax.xlane.f32.xlu1 %v1389_v56 }
 0x5aa   :  { %1399 = vmax.xlane.f32.xlu2 %v1398_v59 }
 0x5b2   :  { %1402 = vmax.xlane.f32.xlu2 %v1401_v19 }
 0x5b5   :  { %2528 = vrot.lane.b32.xlu0 %v3252_v63, %s2814_s16 }
 0x5dc   :  { %v1382_v53 = vpop.xlane.xlu2 %1381 }
 0x5dd   :  { %v1404_v6 = vsub.f32 %v1269_v22, %v1382_v53 }
 0x5df   :  { %v1412_v52 = vmul.f32 1.442695, %v1404_v6 }
 0x5e1   :  { %2613 = vpow2.f32 %v1412_v52 }
 0x5e4   :  { %v1746_v13 = vpop.permute.xlu2 %1745 }
 0x5e7   :  { %v3256_v57 = vpop.eup %2613 }
 0x5e8   :  { %v1428_v7 = vsel %vm290_vm1, %v3256_v57, 0.0 }
 0x5e9   :  { %1429 = vadd.xlane.f32.xlu2 %v1428_v7 }
 0x601   :  { %1668 = vrot.lane.b32.xlu2 %v3017_v3, %s2814_s16 }
 0x609   :  { %1604 = vrot.lane.b32.xlu2 %v3013_v1, %s2814_s16 }
 0x60c   :  { %v1388_v0 = vpop.xlane.xlu0 %1387 }
 0x60d   :  { %v1406_v2 = vsub.f32 %v1304_v43, %v1388_v0 }
 0x60f   :  { %v1416_v47 = vmul.f32 1.442695, %v1406_v2 }
 0x611   :  { %2615 = vpow2.f32 %v1416_v47  ;;  %1811 = vrot.lane.b32.xlu2 %v2935_v45, %s2815_s17  ;;  %v3276_v45 = vpop.f32.mrf.mxu1 }
 0x614   :  { %v1394_v5 = vpop.xlane.xlu0 %1393  ;;  %v1391_v19 = vpop.xlane.xlu1 %1390 }
 0x615   :  { %v1408_v32 = vsub.f32 %v1339_v54, %v1394_v5  ;;  %v1407_v0 = vsub.f32 %v3243_v55, %v1391_v19 }
 0x617   :  { %v3266_v8 = vpop.eup %2615  ;;  %v1420_v14 = vmul.f32 1.442695, %v1408_v32  ;;  %v1418_v32 = vmul.f32 1.442695, %v1407_v0 }
 0x618   :  { %v1434_v61 = vsel %vm290_vm1, %v3266_v8, 0.0 }
 0x619   :  { %1813 = vrot.lane.b32.xlu2 %v2950_v49, %s2815_s17  ;;  %1435 = vadd.xlane.f32.xlu1 %v1434_v61  ;;  %2617 = vpow2.f32 %v1420_v14  ;;  %v1395_v49 = vsel %vm290_vm1, %v3276_v45, -inf }
 0x61d   :  { %v1400_v18 = vpop.xlane.xlu2 %1399 }
 0x61e   :  { %v1410_v16 = vsub.f32 %v1374_v50, %v1400_v18 }
 0x61f   :  { %v3281_v58 = vpop.eup %2617 }
 0x620   :  { %v1440_v20 = vsel %vm290_vm1, %v3281_v58, 0.0  ;;  %v1424_v24 = vmul.f32 1.442695, %v1410_v16 }
 0x621   :  { %1384 = vmax.xlane.f32.xlu1 %v1383_v4 }
 0x622   :  { %2619 = vpow2.f32 %v1424_v24 }
 0x625   :  { %v1403_v28 = vpop.xlane.xlu2 %1402 }
 0x626   :  { %v1411_v26 = vsub.f32 %v1377_v21, %v1403_v28 }
 0x627   :  { %v2529_v15 = vpop.permute.xlu0 %2528 }
 0x628   :  { %v2531_v9 = vunpack.i.h.bf16 %v2529_v15  ;;  %v2530_v17 = vunpack.i.l.bf16 %v2529_v15  ;;  %v1426_v11 = vmul.f32 1.442695, %v1411_v26  ;;  %v3285_v27 = vpop.eup %2619 }
 0x629   :  { %1396 = vmax.xlane.f32.xlu1 %v1395_v49  ;;  %v1446_v25 = vsel %vm290_vm1, %v3285_v27, 0.0 }
 0x62a   :  { %1596 = vmatpush.msrb.mxu3 %v2530_v17  ;;  %1660 = vmatpush.msra.mxu1 %v2531_v9  ;;  %2621 = vpow2.f32 %v1426_v11 }
 0x62c   :  { %2446 = vmatpush.xpose.msk.msra.mxu3 %vm290_vm1, %v1746_v13 }
 0x630   :  { %v3289_v29 = vpop.eup %2621 }
 0x631   :  { %1441 = vadd.xlane.f32.xlu1 %v1440_v20  ;;  %v1449_v22 = vsel %vm290_vm1, %v3289_v29, 0.0 }
 0x642   :  { %1447 = vadd.xlane.f32.xlu2 %v1446_v25 }
 0x64a   :  { %1450 = vadd.xlane.f32.xlu2 %v1449_v22  ;;  %1741 = vrot.lane.b32.xlu1 %v2905_v33, %s2815_s17 }
 0x652   :  { %1743 = vrot.lane.b32.xlu1 %v2898_v31, %s2815_s17 }
 0x65a   :  { %1815 = vrot.lane.b32.xlu1 %v2923_v39, %s2815_s17 }
 0x65c   :  { %v1430_v62 = vpop.xlane.xlu2 %1429 }
 0x65d   :  { %2623 = vrcp.f32 %v1430_v62  ;;  %v1463_v33 = vand.u32 2147483648, %v1430_v62  ;;  %v1461_v31 = vand.u32 2147483647, %v1430_v62  ;;  %vm1457_vm11 = vweird.f32 %v1430_v62 }
 0x65f   :  { %v1464_v39 = vor.u32 1.1754944e-38, %v1463_v33  ;;  %vm1462_vm13 = vcmp.eq.f32.partialorder %v1461_v31, 8.507059e+37 }
 0x662   :  { %1848 = vrot.lane.b32.xlu2 %v2947_v48, %s2815_s17  ;;  %1850 = vrot.lane.b32.xlu1 %v2932_v44, %s2815_s17 }
 0x663   :  { %v2624_v43 = vpop.eup %2623 }
 0x664   :  { %v1453_v51 = vmul.f32 %v2624_v43, %v1430_v62  ;;  %v1669_v54 = vpop.permute.xlu2 %1668  ;;  %vm1458_vm10 = vweird.f32 %v2624_v43 }
 0x665   :  { %1692 = vmatpush.msrb.mxu2 %v1669_v54  ;;  %vm1459_vm12 = vmor %vm1457_vm11, %vm1458_vm10 }
 0x666   :  { %v1454_v30 = vsub.f32 1.0, %v1453_v51 }
 0x668   :  { %v1455_v56 = vmul.f32 %v2624_v43, %v1454_v30 }
 0x66a   :  { %v1456_v50 = vadd.f32 %v2624_v43, %v1455_v56  ;;  %1778 = vrot.lane.b32.xlu2 %v2926_v40, %s2815_s17  ;;  %1780 = vrot.lane.b32.xlu1 %v2914_v35, %s2815_s17 }
 0x66c   :  { %v1460_v44 = vsel %vm1459_vm12, %v2624_v43, %v1456_v50  ;;  %v1605_v48 = vpop.permute.xlu2 %1604 }
 0x66d   :  { %v1465_v59 = vsel %vm1462_vm13, %v1464_v39, %v1460_v44  ;;  %1628 = vmatpush.msra.mxu0 %v1605_v48 }
 0x66e   :  { %v1564_v21 = vmul.f32 %v3256_v57, %v1465_v59 }
 0x670   :  { %2438 = vmatmul.msk.f32.vlgmr.msrb.gmra.mxu3 %vm290_vm1, %v1564_v21 }
 0x674   :  { %v3318_v18 = vpop.permute.xlu2 %1811 }
 0x67c   :  { %v3328_v11 = vpop.permute.xlu2 %1813 }
 0x68c   :  { %v1436_v53 = vpop.xlane.xlu1 %1435 }
 0x68d   :  { %2625 = vrcp.f32 %v1436_v53  ;;  %v1491_v2 = vand.u32 2147483648, %v1436_v53  ;;  %v1489_v5 = vand.u32 2147483647, %v1436_v53  ;;  %vm1485_vm15 = vweird.f32 %v1436_v53 }
 0x68f   :  { %v1492_v4 = vor.u32 1.1754944e-38, %v1491_v2  ;;  %vm1490_vm3 = vcmp.eq.f32.partialorder %v1489_v5, 8.507059e+37 }
 0x693   :  { %v2626_v6 = vpop.eup %2625 }
 0x694   :  { %v1481_v52 = vmul.f32 %v2626_v6, %v1436_v53  ;;  %v1385_v40 = vpop.xlane.xlu1 %1384  ;;  %vm1486_vm14 = vweird.f32 %v2626_v6 }
 0x695   :  { %v1405_v7 = vsub.f32 %v3272_v12, %v1385_v40  ;;  %vm1487_vm2 = vmor %vm1485_vm15, %vm1486_vm14 }
 0x696   :  { %v1482_v35 = vsub.f32 1.0, %v1481_v52 }
 0x697   :  { %v1414_v47 = vmul.f32 1.442695, %v1405_v7 }
 0x698   :  { %v1483_v61 = vmul.f32 %v2626_v6, %v1482_v35 }
 0x699   :  { %2627 = vpow2.f32 %v1414_v47 }
 0x69a   :  { %v1484_v57 = vadd.f32 %v2626_v6, %v1483_v61  ;;  %2629 = vpow2.f32 %v1418_v32 }
 0x69c   :  { %v1488_v13 = vsel %vm1487_vm2, %v2626_v6, %v1484_v57  ;;  %v1397_v14 = vpop.xlane.xlu1 %1396 }
 0x69d   :  { %v1493_v15 = vsel %vm1490_vm3, %v1492_v4, %v1488_v13  ;;  %v1409_v12 = vsub.f32 %v3276_v45, %v1397_v14 }
 0x69e   :  { %v1566_v9 = vmul.f32 %v3266_v8, %v1493_v15 }
 0x69f   :  { %v3313_v55 = vpop.eup %2627  ;;  %v1422_v17 = vmul.f32 1.442695, %v1409_v12 }
 0x6a0   :  { %2440 = vmatmul.msk.f32.vlgmr.msra.gmra.mxu0 %vm290_vm1, %v1566_v9  ;;  %v1431_v49 = vsel %vm290_vm1, %v3313_v55, 0.0  ;;  %v3320_v20 = vpop.eup %2629 }
 0x6a1   :  { %2631 = vpow2.f32 %v1422_v17  ;;  %1432 = vadd.xlane.f32.xlu0 %v1431_v49  ;;  %v1437_v8 = vsel %vm290_vm1, %v3320_v20, 0.0 }
 0x6a4   :  { %v1442_v16 = vpop.xlane.xlu1 %1441 }
 0x6a5   :  { %2633 = vrcp.f32 %v1442_v16  ;;  %v1519_v22 = vand.u32 2147483648, %v1442_v16  ;;  %v1517_v43 = vand.u32 2147483647, %v1442_v16  ;;  %vm1513_vm5 = vweird.f32 %v1442_v16 }
 0x6a7   :  { %v3322_v45 = vpop.eup %2631  ;;  %v1520_v54 = vor.u32 1.1754944e-38, %v1519_v22  ;;  %vm1518_vm7 = vcmp.eq.f32.partialorder %v1517_v43, 8.507059e+37 }
 0x6a8   :  { %v1443_v24 = vsel %vm290_vm1, %v3322_v45, 0.0 }
 0x6a9   :  { %1438 = vadd.xlane.f32.xlu0 %v1437_v8  ;;  %1444 = vadd.xlane.f32.xlu1 %v1443_v24 }
 0x6ab   :  { %v2634_v28 = vpop.eup %2633 }
 0x6ac   :  { %v1509_v26 = vmul.f32 %v2634_v28, %v1442_v16  ;;  %vm1514_vm4 = vweird.f32 %v2634_v28 }
 0x6ad   :  { %vm1515_vm6 = vmor %vm1513_vm5, %vm1514_vm4 }
 0x6ae   :  { %v1510_v25 = vsub.f32 1.0, %v1509_v26 }
 0x6b0   :  { %v1511_v62 = vmul.f32 %v2634_v28, %v1510_v25 }
 0x6b2   :  { %v1512_v51 = vadd.f32 %v2634_v28, %v1511_v62 }
 0x6b4   :  { %v1516_v30 = vsel %vm1515_vm6, %v2634_v28, %v1512_v51 }
 0x6b5   :  { %v1521_v33 = vsel %vm1518_vm7, %v1520_v54, %v1516_v30  ;;  %v1448_v56 = vpop.xlane.xlu2 %1447 }
 0x6b6   :  { %2635 = vrcp.f32 %v1448_v56  ;;  %v1568_v31 = vmul.f32 %v3281_v58, %v1521_v33  ;;  %v1547_v21 = vand.u32 2147483648, %v1448_v56  ;;  %v1545_v53 = vand.u32 2147483647, %v1448_v56 }
 0x6b7   :  { %vm1541_vm9 = vweird.f32 %v1448_v56 }
 0x6b8   :  { %2442 = vmatmul.msk.f32.vlgmr.msra.gmra.mxu1 %vm290_vm1, %v1568_v31  ;;  %v1548_v52 = vor.u32 1.1754944e-38, %v1547_v21  ;;  %vm1546_vm11 = vcmp.eq.f32.partialorder %v1545_v53, 8.507059e+37 }
 0x6bc   :  { %v2636_v50 = vpop.eup %2635  ;;  %v3332_v39 = vpop.permute.xlu1 %1741 }
 0x6bd   :  { %v1537_v44 = vmul.f32 %v2636_v50, %v1448_v56  ;;  %v1451_v48 = vpop.xlane.xlu2 %1450  ;;  %1846 = vrot.lane.b32.xlu0 %v2938_v46, %s2815_s17  ;;  %vm1542_vm8 = vweird.f32 %v2636_v50 }
 0x6be   :  { %2637 = vrcp.f32 %v1451_v48  ;;  %vm1543_vm10 = vmor %vm1541_vm9, %vm1542_vm8  ;;  %v1561_v47 = vand.u32 2147483648, %v1451_v48  ;;  %vm1555_vm13 = vweird.f32 %v1451_v48 }
 0x6bf   :  { %v1538_v59 = vsub.f32 1.0, %v1537_v44 }
 0x6c0   :  { %v1562_v57 = vor.u32 1.1754944e-38, %v1561_v47 }
 0x6c1   :  { %v1539_v19 = vmul.f32 %v2636_v50, %v1538_v59 }
 0x6c2   :  { %1776 = vrot.lane.b32.xlu1 %v2917_v36, %s2815_s17  ;;  %v1559_v36 = vand.u32 2147483647, %v1451_v48 }
 0x6c3   :  { %v1540_v58 = vadd.f32 %v2636_v50, %v1539_v19 }
 0x6c4   :  { %v2638_v6 = vpop.eup %2637  ;;  %v3338_v40 = vpop.permute.xlu1 %1743  ;;  %vm1560_vm15 = vcmp.eq.f32.partialorder %v1559_v36, 8.507059e+37 }
 0x6c5   :  { %v1544_v7 = vsel %vm1543_vm10, %v2636_v50, %v1540_v58  ;;  %v1551_v35 = vmul.f32 %v2638_v6, %v1451_v48  ;;  %vm1556_vm12 = vweird.f32 %v2638_v6 }
 0x6c6   :  { %v1549_v46 = vsel %vm1546_vm11, %v1548_v52, %v1544_v7  ;;  %vm1557_vm14 = vmor %vm1555_vm13, %vm1556_vm12 }
 0x6c7   :  { %v1552_v0 = vsub.f32 1.0, %v1551_v35  ;;  %v1570_v2 = vmul.f32 %v3285_v27, %v1549_v46 }
 0x6c9   :  { %v1553_v61 = vmul.f32 %v2638_v6, %v1552_v0  ;;  %2444 = vmatmul.msk.f32.vlgmr.msrb.gmra.mxu2 %vm290_vm1, %v1570_v2 }
 0x6cb   :  { %v1554_v5 = vadd.f32 %v2638_v6, %v1553_v61  ;;  %v1849_v61 = vpop.permute.xlu2 %1848 }
 0x6cc   :  { %v1816_v32 = vpop.permute.xlu1 %1815 }
 0x6cd   :  { %2452 = vmatpush.xpose.msk.msrb.mxu1 %vm290_vm1, %v1816_v32  ;;  %v1558_v4 = vsel %vm1557_vm14, %v2638_v6, %v1554_v5 }
 0x6ce   :  { %v1563_v13 = vsel %vm1560_vm15, %v1562_v57, %v1558_v4 }
 0x6cf   :  { %v1571_v14 = vmul.f32 %v3289_v29, %v1563_v13 }
 0x6d1   :  { %2445 = vmatmul.msk.f32.gmra.mxu2 %vm290_vm1, %v1571_v14 }
 0x6d4   :  { %v1851_v27 = vpop.permute.xlu1 %1850 }
 0x6d5   :  { %2455 = vmatpush.xpose.msk.msra.mxu2 %vm290_vm1, %v1851_v27 }
 0x6dc   :  { %v1781_v15 = vpop.permute.xlu1 %1780 }
 0x6dd   :  { %2449 = vmatpush.xpose.msk.msrb.mxu0 %vm290_vm1, %v1781_v15 }
 0x714   :  { %v1433_v12 = vpop.xlane.xlu0 %1432 }
 0x715   :  { %2639 = vrcp.f32 %v1433_v12  ;;  %v1477_v24 = vand.u32 2147483648, %v1433_v12  ;;  %v1475_v29 = vand.u32 2147483647, %v1433_v12  ;;  %vm1471_vm3 = vweird.f32 %v1433_v12 }
 0x717   :  { %v1478_v22 = vor.u32 1.1754944e-38, %v1477_v24  ;;  %vm1476_vm5 = vcmp.eq.f32.partialorder %v1475_v29, 8.507059e+37 }
 0x71b   :  { %v2640_v9 = vpop.eup %2639 }
 0x71c   :  { %v1467_v17 = vmul.f32 %v2640_v9, %v1433_v12  ;;  %v1439_v49 = vpop.xlane.xlu0 %1438  ;;  %v1445_v16 = vpop.xlane.xlu1 %1444  ;;  %vm1472_vm2 = vweird.f32 %v2640_v9 }
 0x71d   :  { %2641 = vrcp.f32 %v1439_v49  ;;  %vm1473_vm4 = vmor %vm1471_vm3, %vm1472_vm2  ;;  %v1505_v31 = vand.u32 2147483648, %v1439_v49  ;;  %v1533_v48 = vand.u32 2147483648, %v1445_v16  ;;  %v1503_v59 = vand.u32 2147483647, %v1439_v49 }
 0x71e   :  { %v1468_v8 = vsub.f32 1.0, %v1467_v17  ;;  %2643 = vrcp.f32 %v1445_v16  ;;  %v1531_v19 = vand.u32 2147483647, %v1445_v16  ;;  %vm1499_vm8 = vweird.f32 %v1439_v49 }
 0x71f   :  { %v1506_v58 = vor.u32 1.1754944e-38, %v1505_v31  ;;  %vm1527_vm9 = vweird.f32 %v1445_v16  ;;  %v1534_v52 = vor.u32 1.1754944e-38, %v1533_v48  ;;  %vm1504_vm11 = vcmp.eq.f32.partialorder %v1503_v59, 8.507059e+37 }
 0x720   :  { %v1469_v28 = vmul.f32 %v2640_v9, %v1468_v8  ;;  %vm1532_vm13 = vcmp.eq.f32.partialorder %v1531_v19, 8.507059e+37 }
 0x722   :  { %v1470_v26 = vadd.f32 %v2640_v9, %v1469_v28 }
 0x723   :  { %v2642_v25 = vpop.eup %2641 }
 0x724   :  { %v2644_v62 = vpop.eup %2643  ;;  %v1495_v43 = vmul.f32 %v2642_v25, %v1439_v49  ;;  %v1474_v51 = vsel %vm1473_vm4, %v2640_v9, %v1470_v26  ;;  %vm1500_vm6 = vweird.f32 %v2642_v25  ;;  %vm1231_vm4 = vcmask 130112  }
 0x725   :  { %v1523_v54 = vmul.f32 %v2644_v62, %v1445_v16  ;;  %v1479_v30 = vsel %vm1476_vm5, %v1478_v22, %v1474_v51  ;;  %vm1528_vm7 = vweird.f32 %v2644_v62  ;;  %vm1501_vm10 = vmor %vm1499_vm8, %vm1500_vm6 }
 0x726   :  { %v1496_v33 = vsub.f32 1.0, %v1495_v43  ;;  %v1565_v56 = vmul.f32 %v3313_v55, %v1479_v30  ;;  %vm1529_vm12 = vmor %vm1527_vm9, %vm1528_vm7 }
 0x727   :  { %v1524_v50 = vsub.f32 1.0, %v1523_v54 }
 0x728   :  { %v1497_v44 = vmul.f32 %v2642_v25, %v1496_v33  ;;  %2439 = vmatmul.msk.f32.gmra.mxu3 %vm290_vm1, %v1565_v56 }
 0x729   :  { %v1525_v21 = vmul.f32 %v2644_v62, %v1524_v50 }
 0x72a   :  { %v1498_v53 = vadd.f32 %v2642_v25, %v1497_v44 }
 0x72b   :  { %v1526_v6 = vadd.f32 %v2644_v62, %v1525_v21 }
 0x72c   :  { %v1502_v7 = vsel %vm1501_vm10, %v2642_v25, %v1498_v53 }
 0x72d   :  { %v1507_v55 = vsel %vm1504_vm11, %v1506_v58, %v1502_v7  ;;  %v1530_v35 = vsel %vm1529_vm12, %v2644_v62, %v1526_v6 }
 0x72e   :  { %v1567_v46 = vmul.f32 %v3320_v20, %v1507_v55  ;;  %v1535_v0 = vsel %vm1532_vm13, %v1534_v52, %v1530_v35  ;;  %v1779_v20 = vpop.permute.xlu2 %1778 }
 0x72f   :  { %v1847_v2 = vpop.permute.xlu0 %1846  ;;  %v1569_v47 = vmul.f32 %v3322_v45, %v1535_v0  ;;  %v3365_v45 = vpop.f32.mrf.mxu3 }
 0x730   :  { %2441 = vmatmul.msk.f32.gmra.mxu0 %vm290_vm1, %v1567_v46  ;;  %2447 = vmatmul.msk.f32.vlgmr.msra.gmra.mxu3 %vm290_vm1, %v3332_v39 }
 0x731   :  { %2443 = vmatmul.msk.f32.gmra.mxu1 %vm290_vm1, %v1569_v47  ;;  %2456 = vmatmul.msk.f32.vlgmr.msra.gmra.mxu2 %vm290_vm1, %v1847_v2 }
 0x734   :  { %v1777_v36 = vpop.permute.xlu1 %1776 }
 0x735   :  { %v3367_v39 = vpop.f32.mrf.mxu1 }
 0x738   :  { %2448 = vmatmul.msk.f32.gmra.mxu3 %vm290_vm1, %v3338_v40  ;;  %2450 = vmatmul.msk.f32.vlgmr.msrb.gmra.mxu0 %vm290_vm1, %v1777_v36  ;;  %v3371_v40 = vpop.f32.mrf.mxu0 }
 0x739   :  { %2453 = vmatmul.msk.f32.vlgmr.msrb.gmra.mxu1 %vm290_vm1, %v3318_v18  ;;  %2457 = vmatmul.msk.f32.gmra.mxu2 %vm290_vm1, %v1849_v61 }
 0x740   :  { %2451 = vmatmul.msk.f32.gmra.mxu0 %vm290_vm1, %v1779_v20 }
 0x741   :  { %2454 = vmatmul.msk.f32.gmra.mxu1 %vm290_vm1, %v3328_v11 }
 0x74c   :  { %v3369_v5 = vpop.f32.mrf.mxu2 }
 0x754   :  { %v3377_v18 = vpop.f32.mrf.mxu2 }
 0x7ab   :  { %v3373_v57 = vpop.f32.mrf.mxu3 }
 0x7ad   :  { %v3379_v4 = vpop.f32.mrf.mxu0 }
 0x7ae   :  { %v3375_v32 = vpop.f32.mrf.mxu1 }
 0x7b3   :  { %v3381_v13 = vpop.f32.mrf.mxu3 }
 0x7b4   :  { %v1881_v11 = vsel %vm290_vm1, %v3381_v13, -inf  ;;  %v1875_v15 = vpop.f32.mrf.mxu2 }
 0x7b5   :  { %1882 = vmax.xlane.f32.xlu0 %v1881_v11  ;;  %v1805_v9 = vpop.f32.mrf.mxu0  ;;  %v1899_v28 = vsel %vm290_vm1, %v1875_v15, -inf }
 0x7b6   :  { %v1840_v14 = vpop.f32.mrf.mxu1  ;;  %v1887_v8 = vsel %vm290_vm1, %v1805_v9, -inf }
 0x7b7   :  { %v1893_v27 = vsel %vm290_vm1, %v1840_v14, -inf }
 0x7b8   :  { %1894 = vmax.xlane.f32.xlu2 %v1893_v27 }
 0x7bb   :  { %v1773_v12 = vpop.f32.mrf.mxu3 }
 0x7bc   :  { %v1884_v17 = vsel %vm290_vm1, %v1773_v12, -inf  ;;  %v1878_v24 = vpop.f32.mrf.mxu2 }
 0x7bd   :  { %1885 = vmax.xlane.f32.xlu1 %v1884_v17  ;;  %v1902_v29 = vsel %vm290_vm1, %v1878_v24, -inf  ;;  %v1808_v26 = vpop.f32.mrf.mxu0 }
 0x7be   :  { %v1843_v49 = vpop.f32.mrf.mxu1  ;;  %v1890_v25 = vsel %vm290_vm1, %v1808_v26, -inf }
 0x7bf   :  { %v1896_v16 = vsel %vm290_vm1, %v1843_v49, -inf }
 0x7c0   :  { %1897 = vmax.xlane.f32.xlu0 %v1896_v16  ;;  %1888 = vmax.xlane.f32.xlu2 %v1887_v8  ;;  %v2250_v8 = vld [vmem:[#allocation9] sm:$0xff] }
 0x7c5   :  { %1900 = vmax.xlane.f32.xlu1 %v1899_v28 }
 0x7c8   :  { %1903 = vmax.xlane.f32.xlu0 %v1902_v29 }
 0x7cd   :  { %1891 = vmax.xlane.f32.xlu1 %v1890_v25 }
 0x828   :  { %v1883_v22 = vpop.xlane.xlu0 %1882 }
 0x829   :  { %v1905_v61 = vsub.f32 %v3381_v13, %v1883_v22 }
 0x82b   :  { %v1895_v62 = vpop.xlane.xlu2 %1894  ;;  %v1913_v11 = vmul.f32 1.442695, %v1905_v61 }
 0x82c   :  { %v1909_v43 = vsub.f32 %v1840_v14, %v1895_v62 }
 0x82e   :  { %v1921_v51 = vmul.f32 1.442695, %v1909_v43 }
 0x830   :  { %2645 = vpow2.f32 %v1921_v51  ;;  %v1886_v54 = vpop.xlane.xlu1 %1885 }
 0x831   :  { %v1906_v30 = vsub.f32 %v1773_v12, %v1886_v54 }
 0x833   :  { %v1915_v33 = vmul.f32 1.442695, %v1906_v30  ;;  %v1898_v56 = vpop.xlane.xlu0 %1897  ;;  %v1889_v31 = vpop.xlane.xlu2 %1888 }
 0x834   :  { %v1907_v50 = vsub.f32 %v1805_v9, %v1889_v31 }
 0x835   :  { %2647 = vpow2.f32 %v1915_v33 }
 0x836   :  { %v3392_v44 = vpop.eup %2645  ;;  %v1917_v48 = vmul.f32 1.442695, %v1907_v50 }
 0x837   :  { %v1941_v59 = vsel %vm290_vm1, %v3392_v44, 0.0 }
 0x838   :  { %1942 = vadd.xlane.f32.xlu1 %v1941_v59  ;;  %v1901_v21 = vpop.xlane.xlu1 %1900  ;;  %2649 = vpow2.f32 %v1917_v48 }
 0x839   :  { %v1911_v19 = vsub.f32 %v1875_v15, %v1901_v21  ;;  %v1910_v15 = vsub.f32 %v1843_v49, %v1898_v56 }
 0x83b   :  { %v3396_v53 = vpop.eup %2647  ;;  %v1925_v58 = vmul.f32 1.442695, %v1911_v19  ;;  %v1904_v6 = vpop.xlane.xlu0 %1903  ;;  %v1923_v9 = vmul.f32 1.442695, %v1910_v15 }
 0x83c   :  { %v1912_v52 = vsub.f32 %v1878_v24, %v1904_v6  ;;  %v1932_v7 = vsel %vm290_vm1, %v3396_v53, 0.0  ;;  %v2251_v24 = vld [vmem:[#allocation9 + $0x8] sm:$0xff] }
 0x83d   :  { %2651 = vpow2.f32 %v1925_v58  ;;  %1933 = vadd.xlane.f32.xlu0 %v1932_v7  ;;  %v2542_v29 = vpack.i.bf16 %v2250_v8, %v2251_v24 }
 0x83e   :  { %v3400_v55 = vpop.eup %2649  ;;  %v1927_v35 = vmul.f32 1.442695, %v1912_v52 }
 0x83f   :  { %v1935_v46 = vsel %vm290_vm1, %v3400_v55, 0.0 }
 0x840   :  { %v1892_v0 = vpop.xlane.xlu1 %1891  ;;  %1936 = vadd.xlane.f32.xlu2 %v1935_v46  ;;  %2653 = vpow2.f32 %v1927_v35 }
 0x841   :  { %v1908_v2 = vsub.f32 %v1808_v26, %v1892_v0 }
 0x843   :  { %v3404_v47 = vpop.eup %2651  ;;  %v1919_v36 = vmul.f32 1.442695, %v1908_v2 }
 0x844   :  { %v1947_v20 = vsel %vm290_vm1, %v3404_v47, 0.0 }
 0x845   :  { %2655 = vpow2.f32 %v1919_v36  ;;  %1948 = vadd.xlane.f32.xlu0 %v1947_v20 }
 0x846   :  { %v3409_v14 = vpop.eup %2653  ;;  %2657 = vpow2.f32 %v1913_v11 }
 0x847   :  { %v1950_v12 = vsel %vm290_vm1, %v3409_v14, 0.0  ;;  %2659 = vpow2.f32 %v1923_v9 }
 0x84b   :  { %v3411_v27 = vpop.eup %2655 }
 0x84c   :  { %v1938_v13 = vsel %vm290_vm1, %v3411_v27, 0.0  ;;  %v3417_v17 = vpop.eup %2657 }
 0x84d   :  { %1951 = vadd.xlane.f32.xlu0 %v1950_v12  ;;  %1939 = vadd.xlane.f32.xlu2 %v1938_v13  ;;  %v1929_v16 = vsel %vm290_vm1, %v3417_v17, 0.0  ;;  %v3423_v49 = vpop.eup %2659 }
 0x84e   :  { %v1944_v28 = vsel %vm290_vm1, %v3423_v49, 0.0 }
 0x851   :  { %2533 = vrot.lane.b32.xlu1 %v3252_v63, %s2815_s17  ;;  %v2253_v63 = vld [vmem:[#allocation9 + $0x18] sm:$0xff] }
 0x855   :  { %1930 = vadd.xlane.f32.xlu2 %v1929_v16 }
 0x859   :  { %1207 = vrot.lane.b32.xlu1 %v3223_v34, %s2807_s27  ;;  %v2252_v34 = vld [vmem:[#allocation9 + $0x10] sm:$0xff] }
 0x85a   :  { %v2537_v26 = vpack.i.bf16 %v2252_v34, %v2253_v63 }
 0x85d   :  { %1945 = vadd.xlane.f32.xlu2 %v1944_v28 }
 0x861   :  { %2543 = vrot.lane.b32.xlu1 %v2542_v29, %s2816_s18  ;;  %2169 = vrot.lane.b32.xlu0 %v3017_v3, %s2815_s17 }
 0x869   :  { %1217 = vrot.lane.b32.xlu1 %v3238_v41, %s2807_s27  ;;  %1708 = vrot.lane.b32.xlu0 %v3365_v45, %s2817_s19 }
 0x871   :  { %1219 = vrot.lane.b32.xlu1 %v3236_v38, %s2807_s27  ;;  %2538 = vrot.lane.b32.xlu0 %v2537_v26, %s2816_s18 }
 0x875   :  { %2105 = vrot.lane.b32.xlu2 %v3013_v1, %s2815_s17 }
 0x879   :  { %1710 = vrot.lane.b32.xlu0 %v3373_v57, %s2817_s19 }
 0x87d   :  { %1209 = vrot.lane.b32.xlu2 %v3225_v60, %s2807_s27 }
 0x881   :  { %1718 = vrot.lane.b32.xlu0 %v3375_v32, %s2817_s19 }
 0x885   :  { %1211 = vrot.lane.b32.xlu2 %v3230_v23, %s2807_s27 }
 0x889   :  { %1712 = vrot.lane.b32.xlu0 %v3371_v40, %s2817_s19 }
 0x891   :  { %1720 = vrot.lane.b32.xlu0 %v3369_v5, %s2817_s19 }
 0x899   :  { %1714 = vrot.lane.b32.xlu0 %v3379_v4, %s2817_s19 }
 0x8a1   :  { %1722 = vrot.lane.b32.xlu0 %v3377_v18, %s2817_s19 }
 0x8a9   :  { %1716 = vrot.lane.b32.xlu0 %v3367_v39, %s2817_s19 }
 0x8ab   :  { %v1943_v1 = vpop.xlane.xlu1 %1942 }
 0x8ac   :  { %2661 = vrcp.f32 %v1943_v1  ;;  %v2020_v57 = vand.u32 2147483648, %v1943_v1  ;;  %vm2014_vm15 = vweird.f32 %v1943_v1  ;;  %v2018_v39 = vand.u32 2147483647, %v1943_v1 }
 0x8ae   :  { %v2021_v25 = vor.u32 1.1754944e-38, %v2020_v57  ;;  %vm2019_vm3 = vcmp.eq.f32.partialorder %v2018_v39, 8.507059e+37 }
 0x8b0   :  { %v3451_v3 = vpop.xlane.xlu0 %1933 }
 0x8b2   :  { %v2662_v60 = vpop.eup %2661 }
 0x8b3   :  { %v2010_v38 = vmul.f32 %v2662_v60, %v1943_v1  ;;  %v3453_v45 = vpop.xlane.xlu2 %1936  ;;  %vm2015_vm14 = vweird.f32 %v2662_v60 }
 0x8b4   :  { %2663 = vrcp.f32 %v3453_v45  ;;  %vm2016_vm2 = vmor %vm2014_vm15, %vm2015_vm14  ;;  %v1990_v36 = vand.u32 2147483647, %v3453_v45  ;;  %v1992_v15 = vand.u32 2147483648, %v3453_v45  ;;  %vm1986_vm9 = vweird.f32 %v3453_v45 }
 0x8b5   :  { %v2011_v41 = vsub.f32 1.0, %v2010_v38 }
 0x8b6   :  { %vm3506_vm10 = vcmp.eq.f32.partialorder %v1990_v36, 8.507059e+37  ;;  %v1993_v26 = vor.u32 1.1754944e-38, %v1992_v15 }
 0x8b7   :  { %v2012_v23 = vmul.f32 %v2662_v60, %v2011_v41 }
 0x8b8   :  { %v3456_v40 = vpop.xlane.xlu0 %1948 }
 0x8b9   :  { %2665 = vrcp.f32 %v3456_v40  ;;  %v2013_v5 = vadd.f32 %v2662_v60, %v2012_v23  ;;  %v2048_v0 = vand.u32 2147483648, %v3456_v40  ;;  %vm2042_vm6 = vweird.f32 %v3456_v40 }
 0x8ba   :  { %2667 = vrcp.f32 %v3451_v3  ;;  %v3460_v32 = vpop.eup %2663  ;;  %v2046_v20 = vand.u32 2147483647, %v3456_v40 }
 0x8bb   :  { %v2017_v4 = vsel %vm2016_vm2, %v2662_v60, %v2013_v5  ;;  %v1982_v51 = vmul.f32 %v3460_v32, %v3453_v45  ;;  %vm1987_vm8 = vweird.f32 %v3460_v32  ;;  %v2049_v24 = vor.u32 1.1754944e-38, %v2048_v0 }
 0x8bc   :  { %v2022_v54 = vsel %vm2019_vm3, %v2021_v25, %v2017_v4  ;;  %vm2047_vm11 = vcmp.eq.f32.partialorder %v2046_v20, 8.507059e+37  ;;  %vm3510_vm12 = vmor %vm1986_vm9, %vm1987_vm8  ;;  %v1976_v0 = vand.u32 2147483647, %v3451_v3 }
 0x8bd   :  { %v1983_v50 = vsub.f32 1.0, %v1982_v51  ;;  %v2069_v21 = vmul.f32 %v3392_v44, %v2022_v54 }
 0x8bf   :  { %v2666_v18 = vpop.eup %2665  ;;  %v1984_v35 = vmul.f32 %v3460_v32, %v1983_v50 }
 0x8c0   :  { %v2038_v22 = vmul.f32 %v2666_v18, %v3456_v40  ;;  %v3463_v62 = vpop.xlane.xlu0 %1951  ;;  %v3465_v43 = vpop.xlane.xlu2 %1939  ;;  %vm2043_vm5 = vweird.f32 %v2666_v18 }
 0x8c1   :  { %2669 = vrcp.f32 %v3463_v62  ;;  %v3471_v33 = vpop.eup %2667  ;;  %vm3494_vm7 = vmor %vm2042_vm6, %vm2043_vm5  ;;  %v1985_v13 = vadd.f32 %v3460_v32, %v1984_v35  ;;  %v2062_v60 = vand.u32 2147483648, %v3463_v62  ;;  %vm2056_vm15 = vweird.f32 %v3463_v62 }
 0x8c2   :  { %v2039_v30 = vsub.f32 1.0, %v2038_v22  ;;  %2671 = vrcp.f32 %v3465_v43  ;;  %v1968_v19 = vmul.f32 %v3471_v33, %v3451_v3  ;;  %vm1973_vm14 = vweird.f32 %v3471_v33 }
 0x8c3   :  { %v2534_v56 = vpop.permute.xlu1 %2533  ;;  %v1989_v45 = vsel %vm3510_vm12, %v3460_v32, %v1985_v13  ;;  %v2060_v25 = vand.u32 2147483647, %v3463_v62  ;;  %vm2000_vm5 = vweird.f32 %v3465_v43 }
 0x8c4   :  { %v2536_v31 = vunpack.i.h.bf16 %v2534_v56  ;;  %v2040_v48 = vmul.f32 %v2666_v18, %v2039_v30  ;;  %v2535_v59 = vunpack.i.l.bf16 %v2534_v56  ;;  %v1969_v46 = vsub.f32 1.0, %v1968_v19 }
 0x8c5   :  { %v1994_v22 = vsel %vm3506_vm10, %v1993_v26, %v1989_v45  ;;  %v2063_v56 = vor.u32 1.1754944e-38, %v2062_v60  ;;  %vm2061_vm9 = vcmp.eq.f32.partialorder %v2060_v25, 8.507059e+37  ;;  %v2004_v19 = vand.u32 2147483647, %v3465_v43 }
 0x8c6   :  { %2161 = vmatpush.msra.mxu1 %v2536_v31  ;;  %2097 = vmatpush.msrb.mxu3 %v2535_v59  ;;  %v2041_v44 = vadd.f32 %v2666_v18, %v2040_v48  ;;  %v1970_v8 = vmul.f32 %v3471_v33, %v1969_v46 }
 0x8c7   :  { %v3476_v58 = vpop.eup %2669  ;;  %2462 = vmatmul.msk.f32.vlgmr.msra.gmra.mxu1 %vm290_vm1, %v2069_v21  ;;  %v2067_v21 = vmul.f32 %v3400_v55, %v1994_v22 }
 0x8c8   :  { %v3479_v6 = vpop.eup %2671  ;;  %v2052_v52 = vmul.f32 %v3476_v58, %v3463_v62  ;;  %v3483_v7 = vpop.xlane.xlu2 %1930  ;;  %v2045_v9 = vsel %vm3494_vm7, %v2666_v18, %v2041_v44  ;;  %vm2057_vm13 = vweird.f32 %v3476_v58  ;;  %v3526_v57 = vadd.f32 %v3471_v33, %v1970_v8 }
 0x8c9   :  { %2673 = vrcp.f32 %v3483_v7  ;;  %v1996_v61 = vmul.f32 %v3479_v6, %v3465_v43  ;;  %v2050_v1 = vsel %vm2047_vm11, %v2049_v24, %v2045_v9  ;;  %v1964_v39 = vand.u32 2147483648, %v3483_v7  ;;  %vm3540_vm3 = vmor %vm2056_vm15, %vm2057_vm13 }
 0x8ca   :  { %v2053_v2 = vsub.f32 1.0, %v2052_v52  ;;  %v2071_v4 = vmul.f32 %v3404_v47, %v2050_v1  ;;  %v1962_v54 = vand.u32 2147483647, %v3483_v7  ;;  %v2006_v47 = vand.u32 2147483648, %v3465_v43 }
 0x8cb   :  { %v1208_v11 = vpop.permute.xlu1 %1207  ;;  %v1997_v28 = vsub.f32 1.0, %v1996_v61  ;;  %vm1958_vm6 = vweird.f32 %v3483_v7  ;;  %vm2001_vm7 = vweird.f32 %v3479_v6  ;;  %v1965_v59 = vor.u32 1.1754944e-38, %v1964_v39 }
 0x8cc   :  { %1232 = vst.msk [vmem:[#allocation2] sm:$0xff] %vm1231_vm4, %v1208_v11  ;;  %v2054_v16 = vmul.f32 %v3476_v58, %v2053_v2  ;;  %vm1963_vm10 = vcmp.eq.f32.partialorder %v1962_v54, 8.507059e+37  ;;  %vm1972_vm11 = vweird.f32 %v3451_v3  ;;  %vm3562_vm12 = vmor %vm2000_vm5, %vm2001_vm7  ;;  %vm1732_vm13 = vcmask 195712  }
 0x8cd   :  { %v1998_v40 = vmul.f32 %v3479_v6, %v1997_v28  ;;  %vm3574_vm15 = vmor %vm1972_vm11, %vm1973_vm14  ;;  %v2007_v20 = vor.u32 1.1754944e-38, %v2006_v47  ;;  %vm2005_vm14 = vcmp.eq.f32.partialorder %v2004_v19, 8.507059e+37  ;;  %vm1977_vm5 = vcmp.eq.f32.partialorder %v1976_v0, 8.507059e+37 }
 0x8ce   :  { %v2055_v23 = vadd.f32 %v3476_v58, %v2054_v16 }
 0x8cf   :  { %v2674_v29 = vpop.eup %2673  ;;  %v1999_v50 = vadd.f32 %v3479_v6, %v1998_v40 }
 0x8d0   :  { %v1954_v38 = vmul.f32 %v2674_v29, %v3483_v7  ;;  %v3516_v41 = vpop.xlane.xlu2 %1945  ;;  %vm1959_vm2 = vweird.f32 %v2674_v29  ;;  %v2059_v62 = vsel %vm3540_vm3, %v3476_v58, %v2055_v23  ;;  %v1978_v7 = vand.u32 2147483648, %v3451_v3 }
 0x8d1   :  { %2675 = vrcp.f32 %v3516_v41  ;;  %vm1960_vm8 = vmor %vm1958_vm6, %vm1959_vm2  ;;  %v2064_v44 = vsel %vm2061_vm9, %v2063_v56, %v2059_v62  ;;  %v2003_v36 = vsel %vm3562_vm12, %v3479_v6, %v1999_v50  ;;  %v2034_v11 = vand.u32 2147483648, %v3516_v41 }
 0x8d2   :  { %v1955_v5 = vsub.f32 1.0, %v1954_v38  ;;  %v2072_v12 = vmul.f32 %v3409_v14, %v2064_v44  ;;  %v2032_v6 = vand.u32 2147483647, %v3516_v41  ;;  %v1979_v9 = vor.u32 1.1754944e-38, %v1978_v7 }
 0x8d3   :  { %v3531_v18 = vpop.permute.xlu1 %2543  ;;  %v2170_v32 = vpop.permute.xlu0 %2169  ;;  %v2008_v14 = vsel %vm2005_vm14, %v2007_v20, %v2003_v36  ;;  %vm2028_vm3 = vweird.f32 %v3516_v41 }
 0x8d4   :  { %v1956_v51 = vmul.f32 %v2674_v29, %v1955_v5  ;;  %2193 = vmatpush.msrb.mxu2 %v2170_v32  ;;  %v2068_v28 = vmul.f32 %v3411_v27, %v2008_v14  ;;  %vm2033_vm7 = vcmp.eq.f32.partialorder %v2032_v6, 8.507059e+37  ;;  %v2545_v27 = vunpack.i.l.bf16 %v3531_v18 }
 0x8d5   :  { %2464 = vmatmul.msk.f32.vlgmr.msrb.gmra.mxu2 %vm290_vm1, %v2071_v4  ;;  %v2546_v45 = vunpack.i.h.bf16 %v3531_v18 }
 0x8d6   :  { %v1957_v31 = vadd.f32 %v2674_v29, %v1956_v51 }
 0x8d7   :  { %v2676_v48 = vpop.eup %2675 }
 0x8d8   :  { %v1961_v52 = vsel %vm1960_vm8, %v2674_v29, %v1957_v31  ;;  %v2024_v35 = vmul.f32 %v2676_v48, %v3516_v41  ;;  %v2106_v58 = vpop.permute.xlu2 %2105  ;;  %vm2029_vm2 = vweird.f32 %v2676_v48 }
 0x8d9   :  { %v1966_v46 = vsel %vm1963_vm10, %v1965_v59, %v1961_v52  ;;  %2129 = vmatpush.msra.mxu0 %v2106_v58  ;;  %vm2030_vm6 = vmor %vm2028_vm3, %vm2029_vm2 }
 0x8da   :  { %v2025_v2 = vsub.f32 1.0, %v2024_v35  ;;  %2460 = vmatmul.msk.f32.vlgmr.msra.gmra.mxu0 %vm290_vm1, %v2067_v21  ;;  %v2065_v61 = vmul.f32 %v3417_v17, %v1966_v46  ;;  %v1975_v17 = vsel %vm3574_vm15, %v3471_v33, %v3526_v57  ;;  %v2035_v33 = vor.u32 1.1754944e-38, %v2034_v11 }
 0x8db   :  { %v1218_v3 = vpop.permute.xlu1 %1217  ;;  %v1709_v15 = vpop.permute.xlu0 %1708  ;;  %v1980_v8 = vsel %vm1977_vm5, %v1979_v9, %v1975_v17 }
 0x8dc   :  { %v2026_v13 = vmul.f32 %v2676_v48, %v2025_v2  ;;  %1237 = vst.msk [vmem:[#allocation2 + $0x28] sm:$0xff] %vm1231_vm4, %v1218_v3  ;;  %2458 = vmatmul.msk.f32.vlgmr.msrb.gmra.mxu3 %vm290_vm1, %v2065_v61  ;;  %v2066_v63 = vmul.f32 %v3396_v53, %v1980_v8 }
 0x8dd   :  { %1733 = vst.msk [vmem:[#allocation2] sm:$0xff] %vm1732_vm13, %v1709_v15  ;;  %2465 = vmatmul.msk.f32.gmra.mxu2 %vm290_vm1, %v2072_v12 }
 0x8de   :  { %v2027_v16 = vadd.f32 %v2676_v48, %v2026_v13 }
 0x8e0   :  { %v1210_v24 = vpop.permute.xlu2 %1209  ;;  %v2031_v29 = vsel %vm2030_vm6, %v2676_v48, %v2027_v16  ;;  %v2548_v48 = vld [vmem:[%s3655_s4] ss:$0 sm:$0xff]  ;;  %s2819_s4 = smov [#allocation11]  }
 0x8e1   :  { %1233 = vst.msk [vmem:[#allocation2 + $0x8] sm:$0xff] %vm1231_vm4, %v1210_v24  ;;  %v2036_v34 = vsel %vm2033_vm7, %v2035_v33, %v2031_v29  ;;  %s2353_s23 = sshll.u32 %s2819_s4, 4  ;;  %s2354_s23 = int_to_ptr.vmem [resolvable:$true] %s2353_s23 }
 0x8e2   :  { %2461 = vmatmul.msk.f32.gmra.mxu0 %vm290_vm1, %v2068_v28  ;;  %v2070_v26 = vmul.f32 %v3423_v49, %v2036_v34 }
 0x8e3   :  { %v1220_v1 = vpop.permute.xlu1 %1219  ;;  %v2539_v60 = vpop.permute.xlu0 %2538 }
 0x8e4   :  { %1238 = vst.msk [vmem:[#allocation2 + $0x30] sm:$0xff] %vm1231_vm4, %v1220_v1  ;;  %v2541_v38 = vunpack.i.h.bf16 %v2539_v60  ;;  %v2540_v41 = vunpack.i.l.bf16 %v2539_v60  ;;  %2459 = vmatmul.msk.f32.gmra.mxu3 %vm290_vm1, %v2066_v63  ;;  %2463 = vmatmul.msk.f32.gmra.mxu1 %vm290_vm1, %v2070_v26  ;;  %vm2233_vm1 = vcmask 261312  }
 0x8e6   :  { %2312 = vmatpush.msrb.mxu0 %v2540_v41  ;;  %2483 = vmatpush.msra.mxu3 %v2540_v41 }
 0x8e8   :  { %v1212_v23 = vpop.permute.xlu2 %1211  ;;  %2313 = vmatpush.msrb.mxu0 %v2541_v38  ;;  %2484 = vmatpush.msra.mxu3 %v2541_v38 }
 0x8e9   :  { %1234 = vst.msk [vmem:[#allocation2 + $0x10] sm:$0xff] %vm1231_vm4, %v1212_v23 }
 0x8ea   :  { %2314 = vmatpush.msrb.mxu0 %v2545_v27  ;;  %2485 = vmatpush.msra.mxu3 %v2545_v27 }
 0x8eb   :  { %v1711_v53 = vpop.permute.xlu0 %1710 }
 0x8ec   :  { %1734 = vst.msk [vmem:[#allocation2 + $0x8] sm:$0xff] %vm1732_vm13, %v1711_v53  ;;  %2315 = vmatpush.msrb.mxu0 %v2546_v45  ;;  %2486 = vmatpush.msra.mxu3 %v2546_v45 }
 0x8f3   :  { %v1719_v49 = vpop.permute.xlu0 %1718 }
 0x8f4   :  { %1738 = vst.msk [vmem:[#allocation2 + $0x28] sm:$0xff] %vm1732_vm13, %v1719_v49 }
 0x8fb   :  { %v1713_v40 = vpop.permute.xlu0 %1712 }
 0x8fc   :  { %1735 = vst.msk [vmem:[#allocation2 + $0x10] sm:$0xff] %vm1732_vm13, %v1713_v40 }
 0x903   :  { %v1721_v5 = vpop.permute.xlu0 %1720 }
 0x904   :  { %1739 = vst.msk [vmem:[#allocation2 + $0x30] sm:$0xff] %vm1732_vm13, %v1721_v5 }
 0x944   :  { %v2163_v39 = vpop.f32.mrf.mxu1 }
 0x957   :  { %v2131_v57 = vpop.f32.mrf.mxu0 }
 0x958   :  { %2213 = vrot.lane.b32.xlu2 %v2131_v57, %s2818_s20  ;;  %v2195_v25 = vpop.f32.mrf.mxu2 }
 0x95f   :  { %v2099_v18 = vpop.f32.mrf.mxu3  ;;  %v2134_v22 = vpop.f32.mrf.mxu0 }
 0x960   :  { %2209 = vrot.lane.b32.xlu1 %v2099_v18, %s2818_s20  ;;  %v2198_v51 = vpop.f32.mrf.mxu2 }
 0x961   :  { %v2166_v32 = vpop.f32.mrf.mxu1 }
 0x967   :  { %v2102_v4 = vpop.f32.mrf.mxu3 }
 0x968   :  { %2219 = vrot.lane.b32.xlu1 %v2166_v32, %s2818_s20  ;;  %2211 = vrot.lane.b32.xlu2 %v2102_v4, %s2818_s20 }
 0x970   :  { %1221 = vrot.lane.b32.xlu1 %v3241_v42, %s2807_s27  ;;  %1213 = vrot.lane.b32.xlu2 %v3234_v10, %s2807_s27  ;;  %v1715_v42 = vpop.permute.xlu0 %1714 }
 0x978   :  { %2221 = vrot.lane.b32.xlu1 %v2195_v25, %s2818_s20  ;;  %2215 = vrot.lane.b32.xlu2 %v2134_v22, %s2818_s20  ;;  %v1723_v10 = vpop.permute.xlu0 %1722 }
 0x980   :  { %2223 = vrot.lane.b32.xlu1 %v2198_v51, %s2818_s20  ;;  %1215 = vrot.lane.b32.xlu2 %v3232_v37, %s2807_s27  ;;  %v1717_v59 = vpop.permute.xlu0 %1716 }
 0x988   :  { %2217 = vrot.lane.b32.xlu1 %v2163_v39, %s2818_s20  ;;  %2273 = vrot.lane.b32.xlu2 %v2548_v48, %s2816_s18 }
 0x9b2   :  { %v2214_v54 = vpop.permute.xlu2 %2213 }
 0x9b3   :  { %2236 = vst.msk [vmem:[#allocation2 + $0x10] sm:$0xff] %vm2233_vm1, %v2214_v54 }
 0x9ba   :  { %v2244_v58 = vld [vmem:[#allocation2 + $0x10] sm:$0xff] }
 0x9c2   :  { %v2212_v30 = vpop.permute.xlu2 %2211 }
 0x9c3   :  { %2235 = vst.msk [vmem:[#allocation2 + $0x8] sm:$0xff] %vm2233_vm1, %v2212_v30 }
 0x9ca   :  { %v1214_v56 = vpop.permute.xlu2 %1213  ;;  %v2243_v19 = vld [vmem:[#allocation2 + $0x8] sm:$0xff] }
 0x9cb   :  { %1235 = vst.msk [vmem:[#allocation2 + $0x18] sm:$0xff] %vm1231_vm4, %v1214_v56 }
 0x9cc   :  { %1736 = vst.msk [vmem:[#allocation2 + $0x18] sm:$0xff] %vm1732_vm13, %v1715_v42 }
 0x9d2   :  { %v2210_v47 = vpop.permute.xlu1 %2209  ;;  %v2216_v62 = vpop.permute.xlu2 %2215 }
 0x9d3   :  { %2234 = vst.msk [vmem:[#allocation2] sm:$0xff] %vm2233_vm1, %v2210_v47 }
 0x9d4   :  { %2237 = vst.msk [vmem:[#allocation2 + $0x18] sm:$0xff] %vm2233_vm1, %v2216_v62 }
 0x9da   :  { %v2220_v37 = vpop.permute.xlu1 %2219  ;;  %v1216_v31 = vpop.permute.xlu2 %1215  ;;  %v2242_v50 = vld [vmem:[#allocation2] sm:$0xff] }
 0x9db   :  { %2239 = vst.msk [vmem:[#allocation2 + $0x28] sm:$0xff] %vm2233_vm1, %v2220_v37  ;;  %2466 = vmatmul.msk.f32.vlgmr.msrb.gmra.mxu0 %vm108_vm0, %v2242_v50  ;;  %v2245_v7 = vld [vmem:[#allocation2 + $0x18] sm:$0xff] }
 0x9dc   :  { %1236 = vst.msk [vmem:[#allocation2 + $0x20] sm:$0xff] %vm1231_vm4, %v1216_v31 }
 0x9dd   :  { %1737 = vst.msk [vmem:[#allocation2 + $0x20] sm:$0xff] %vm1732_vm13, %v1717_v59 }
 0x9e2   :  { %v1222_v21 = vpop.permute.xlu1 %1221  ;;  %v2247_v52 = vld [vmem:[#allocation2 + $0x28] sm:$0xff]  ;;  %v2274_v61 = vpop.permute.xlu2 %2273 }
 0x9e3   :  { %1239 = vst.msk [vmem:[#allocation2 + $0x38] sm:$0xff] %vm1231_vm4, %v1222_v21  ;;  %2467 = vmatmul.msk.f32.gmra.mxu0 %vm108_vm0, %v2243_v19  ;;  %2471 = vmatmul.msk.f32.vlgmr.msra.gmra.mxu3 %vm108_vm0, %v2247_v52 }
 0x9e4   :  { %1740 = vst.msk [vmem:[#allocation2 + $0x38] sm:$0xff] %vm1732_vm13, %v1723_v10 }
 0x9ea   :  { %v2222_v35 = vpop.permute.xlu1 %2221 }
 0x9eb   :  { %2240 = vst.msk [vmem:[#allocation2 + $0x30] sm:$0xff] %vm2233_vm1, %v2222_v35  ;;  %2468 = vmatmul.msk.f32.gmra.mxu0 %vm108_vm0, %v2244_v58 }
 0x9f2   :  { %v2224_v44 = vpop.permute.xlu1 %2223  ;;  %v2248_v46 = vld [vmem:[#allocation2 + $0x30] sm:$0xff] }
 0x9f3   :  { %2241 = vst.msk [vmem:[#allocation2 + $0x38] sm:$0xff] %vm2233_vm1, %v2224_v44  ;;  %2469 = vmatmul.msk.f32.gmra.mxu0 %vm108_vm0, %v2245_v7  ;;  %2472 = vmatmul.msk.f32.gmra.mxu3 %vm108_vm0, %v2248_v46 }
 0x9fa   :  { %v2218_v55 = vpop.permute.xlu1 %2217  ;;  %v2249_v0 = vld [vmem:[#allocation2 + $0x38] sm:$0xff] }
 0x9fb   :  { %2238 = vst.msk [vmem:[#allocation2 + $0x20] sm:$0xff] %vm2233_vm1, %v2218_v55  ;;  %2473 = vmatmul.msk.f32.gmra.mxu3 %vm108_vm0, %v2249_v0 }
 0xa02   :  { %v2246_v2 = vld [vmem:[#allocation2 + $0x20] sm:$0xff] }
 0xa03   :  { %2470 = vmatmul.msk.f32.gmra.mxu0 %vm108_vm0, %v2246_v2 }
 0xa58   :  { %v2317_v36 = vpop.f32.mrf.mxu0 }
 0xa59   :  { %v2318_v43 = vadd.f32 %v2317_v36, %v2274_v61 }
 0xa5b   :  { %2341 = vst.msk [vmem:[#allocation11] sm:$0xff] %vm108_vm0, %v2318_v43 }
 0xa60   :  { %v2320_v20 = vpop.f32.mrf.mxu0 }
 0xa61   :  { %v2321_v11 = vadd.f32 %v2320_v20, %v2274_v61 }
 0xa63   :  { %2342 = vst.msk [vmem:[#allocation11 + $0x8] sm:$0xff] %vm108_vm0, %v2321_v11 }
 0xa66   :  { %v2332_v3 = vpop.f32.mrf.mxu3 }
 0xa67   :  { %v2333_v15 = vadd.f32 %v2332_v3, %v2274_v61 }
 0xa68   :  { %v2323_v12 = vpop.f32.mrf.mxu0 }
 0xa69   :  { %2346 = vst.msk [vmem:[#allocation11 + $0x28] sm:$0xff] %vm108_vm0, %v2333_v15  ;;  %v2324_v17 = vadd.f32 %v2323_v12, %v2274_v61 }
 0xa6b   :  { %2343 = vst.msk [vmem:[#allocation11 + $0x10] sm:$0xff] %vm108_vm0, %v2324_v17 }
 0xa70   :  { %v2326_v13 = vpop.f32.mrf.mxu0 }
 0xa71   :  { %v2327_v6 = vadd.f32 %v2326_v13, %v2274_v61 }
 0xa73   :  { %2344 = vst.msk [vmem:[#allocation11 + $0x18] sm:$0xff] %vm108_vm0, %v2327_v6 }
 0xa76   :  { %v2335_v9 = vpop.f32.mrf.mxu3 }
 0xa77   :  { %v2336_v14 = vadd.f32 %v2335_v9, %v2274_v61 }
 0xa79   :  { %2347 = vst.msk [vmem:[#allocation11 + $0x30] sm:$0xff] %vm108_vm0, %v2336_v14 }
 0xa7e   :  { %v2338_v16 = vpop.f32.mrf.mxu3 }
 0xa7f   :  { %v2339_v33 = vadd.f32 %v2338_v16, %v2274_v61 }
 0xa80   :  { %v2329_v8 = vpop.f32.mrf.mxu0 }
 0xa81   :  { %2348 = vst.msk [vmem:[#allocation11 + $0x38] sm:$0xff] %vm108_vm0, %v2339_v33  ;;  %v2330_v24 = vadd.f32 %v2329_v8, %v2274_v61 }
 0xa83   :  { %2345 = vst.msk [vmem:[#allocation11 + $0x20] sm:$0xff] %vm108_vm0, %v2330_v24 }
 0xa84   :  { %2361 = dma.vmem_to_hbm [thread:$0]  %s2354_s23, 1024, %s2356_s28, [#allocation5], %s2806_s26, %s2806_s26, %s2807_s27  }
 0xa85   :  { %2803 = dma.done.wait [#allocation5], 1024  }
 0xa86   :  { %2804 = vsyncadd [#allocation5], 4294966272 }
 0xa87   :  { %2366 = vsyncpa [#allocation4], 1 }
 0xa88   :  { %2367 = vsyncpa [#allocation7], 1 }
 0xa89   :  { %2368 = vsyncpa [#allocation10], 1 }
 0xa8a   :  { %2369 = vsyncpa [#allocation5], 1 }

</bundles_post_ra>
